<compile_context>
chip_gen: v7x
topology: tpu7x:2x2x1
jax: 0.10.0
libtpu: 0.0.40
codegen_flags: <defaults>
</compile_context>

<pallas_src>
import functools
import math

import jax
import jax.numpy as jnp
from jax import lax
from jax.experimental import pallas as pl
from jax.experimental.pallas import tpu as pltpu


def _cross_attn_kernel(seq_ref, cond_ref, wq_ref, wk_ref, wv_ref, wo_ref,
                       bo_ref, gamma_ref, beta_ref, o_ref, *, num_heads, eps):
    bb, S, D = seq_ref.shape            # batch block of query sequences
    T = cond_ref.shape[1]               # key/value (cond) sequence length
    H = num_heads
    Dh = D // H
    m = S // H                          # output rows owned by each head
    scale = 1.0 / math.sqrt(D / H)      # torch: / sqrt(D / num_heads)
    cdt = seq_ref.dtype                 # native MXU operand dtype (no f32 upcast)

    # ---- input projections on flattened (bb*S / bb*T, D) row blocks ---------
    seq2 = seq_ref[...].reshape(bb * S, D)
    cond2 = cond_ref[...].reshape(bb * T, D)
    q = jnp.dot(seq2, wq_ref[...], preferred_element_type=jnp.float32).astype(cdt)
    k = jnp.dot(cond2, wk_ref[...], preferred_element_type=jnp.float32).astype(cdt)
    v = jnp.dot(cond2, wv_ref[...], preferred_element_type=jnp.float32).astype(cdt)

    # 0/1 "deinterleave" selectors: sel[c][r, s] = 1 iff s == r*H + c.
    # Hoisted out of all loops; each selection matmul is an exact copy.
    row_i = lax.broadcasted_iota(jnp.int32, (m, S), 0)
    col_i = lax.broadcasted_iota(jnp.int32, (m, S), 1)
    sels = [(col_i == row_i * H + c).astype(jnp.float32) for c in range(H)]

    bo = bo_ref[...].astype(jnp.float32)         # (1, D)
    gamma = gamma_ref[...].astype(jnp.float32)   # (1, D)
    beta = beta_ref[...].astype(jnp.float32)     # (1, D)

    for b in range(bb):                          # static unroll, bb is small
        qb = q[b * S:(b + 1) * S, :]
        kb = k[b * T:(b + 1) * T, :]
        vb = v[b * T:(b + 1) * T, :]
        for h in range(H):
            qh = qb[:, h * Dh:(h + 1) * Dh]      # (S, Dh)
            kh = kb[:, h * Dh:(h + 1) * Dh]      # (T, Dh)
            vh = vb[:, h * Dh:(h + 1) * Dh]      # (T, Dh)

            # scaled dot-product attention for this head (all S queries)
            scores = lax.dot_general(qh, kh, (((1,), (1,)), ((), ())),
                                     preferred_element_type=jnp.float32) * scale
            scores = scores - jnp.max(scores, axis=-1, keepdims=True)
            p = jnp.exp(scores)
            p = p / jnp.sum(p, axis=-1, keepdims=True)
            # (attention-prob dropout: identity in eval mode)
            yh = jnp.dot(p.astype(cdt), vh,
                         preferred_element_type=jnp.float32)         # (S, Dh) f32

            # torch's y.reshape(N, S, -1): head h fills output rows
            # [h*m, (h+1)*m); column block c of those rows holds yh rows c::H.
            # Fused with head_proj: attn_blk = bo + sum_c (sel_c @ yh) @ Wo[c*Dh:(c+1)*Dh]
            acc = jnp.zeros((m, D), jnp.float32)
            for c in range(H):
                y_c = jnp.dot(sels[c], yh,
                              preferred_element_type=jnp.float32)    # (m, Dh)
                acc = acc + jnp.dot(y_c.astype(cdt),
                                    wo_ref[c * Dh:(c + 1) * Dh, :],
                                    preferred_element_type=jnp.float32)
            attn_blk = acc + bo                                       # (m, D)

            # (post-attention dropout: identity in eval) + residual + LayerNorm
            resid = seq2[b * S + h * m: b * S + (h + 1) * m, :].astype(jnp.float32)
            z = resid + attn_blk
            mean = jnp.mean(z, axis=-1, keepdims=True)
            cen = z - mean
            var = jnp.mean(cen * cen, axis=-1, keepdims=True)
            out_blk = cen * lax.rsqrt(var + eps) * gamma + beta

            o_ref[b, h * m:(h + 1) * m, :] = out_blk.astype(o_ref.dtype)


def cross_attention_block(seq, cond, params, *, num_heads, eps=1e-5, batch_block=1):
    """seq: (B, S, D) queries; cond: (B, T, D) keys/values. Returns (B, S, D)."""
    wq, wk, wv, wo, bo, gamma, beta = params
    B, S, D = seq.shape
    Bc, T, Dc = cond.shape
    assert (B, D) == (Bc, Dc)
    assert D % num_heads == 0, "num_heads must divide embed_dim"
    assert S % num_heads == 0, ("query length must be a multiple of num_heads "
                                "(required by the reference's y.reshape(N, S, -1))")
    bb = batch_block
    assert B % bb == 0

    bo2 = bo.reshape(1, D)
    g2 = gamma.reshape(1, D)
    b2 = beta.reshape(1, D)

    itemsize = seq.dtype.itemsize
    # VMEM budget: double-buffered seq/cond/out tiles + resident weights + f32 temps.
    block_bytes = (2 * bb * S * D + bb * T * D) * itemsize
    weight_bytes = (4 * D * D + 3 * D) * itemsize
    temp_bytes = 8 * bb * max(S, T) * D * 4
    vmem_limit = int(min(max(2 * block_bytes + 2 * weight_bytes + temp_bytes + (8 << 20),
                             32 << 20), 64 << 20))

    flops = int(2 * B * D * D * (2 * S + 2 * T) + 4 * B * S * T * D)
    transcendentals = int(B * num_heads * S * T)
    bytes_accessed = int(itemsize * (2 * B * S * D + B * T * D + 4 * D * D + 3 * D))

    grid = (B // bb,)
    out = pl.pallas_call(
        functools.partial(_cross_attn_kernel, num_heads=num_heads, eps=eps),
        out_shape=jax.ShapeDtypeStruct((B, S, D), seq.dtype),
        grid_spec=pltpu.PrefetchScalarGridSpec(
            num_scalar_prefetch=0,
            grid=grid,
            in_specs=[
                pl.BlockSpec((bb, S, D), lambda i: (i, 0, 0)),   # seq (queries)
                pl.BlockSpec((bb, T, D), lambda i: (i, 0, 0)),   # cond (keys/values)
                pl.BlockSpec((D, D), lambda i: (0, 0)),          # Wq
                pl.BlockSpec((D, D), lambda i: (0, 0)),          # Wk
                pl.BlockSpec((D, D), lambda i: (0, 0)),          # Wv
                pl.BlockSpec((D, D), lambda i: (0, 0)),          # Wo (head_proj)
                pl.BlockSpec((1, D), lambda i: (0, 0)),          # head_proj bias
                pl.BlockSpec((1, D), lambda i: (0, 0)),          # LN gamma
                pl.BlockSpec((1, D), lambda i: (0, 0)),          # LN beta
            ],
            out_specs=pl.BlockSpec((bb, S, D), lambda i: (i, 0, 0)),
        ),
        compiler_params=pltpu.CompilerParams(
            dimension_semantics=("parallel",),
            vmem_limit_bytes=vmem_limit),
        cost_estimate=pl.CostEstimate(flops=flops,
                                      transcendentals=transcendentals,
                                      bytes_accessed=bytes_accessed),
    )(seq, cond, wq, wk, wv, wo, bo2, g2, b2)
    return out


def init_params(key, embed_dim, dtype=jnp.float32):
    """PyTorch-style init (uniform +-1/sqrt(fan_in)); weights in (in, out) layout."""
    kq, kk, kv, ko, kb = jax.random.split(key, 5)
    lim = 1.0 / math.sqrt(embed_dim)
    u = lambda k, shape: jax.random.uniform(k, shape, dtype, -lim, lim)
    wq = u(kq, (embed_dim, embed_dim))
    wk = u(kk, (embed_dim, embed_dim))
    wv = u(kv, (embed_dim, embed_dim))
    wo = u(ko, (embed_dim, embed_dim))
    bo = u(kb, (embed_dim,))
    gamma = jnp.ones((embed_dim,), dtype)
    beta = jnp.zeros((embed_dim,), dtype)
    return wq, wk, wv, wo, bo, gamma, beta


def _reference(seq, cond, params, num_heads, eps=1e-5):
    """Pure-JAX mirror of the PyTorch CrossAttentionBlock forward (eval mode)."""
    wq, wk, wv, wo, bo, gamma, beta = params
    B, S, D = seq.shape
    H = num_heads

    def split_heads(x):  # torch.stack(torch.chunk(x, H, 2), dim=1) -> (B, H, L, Dh)
        return jnp.stack(jnp.split(x, H, axis=2), axis=1)

    q = split_heads(seq @ wq)
    k = split_heads(cond @ wk)
    v = split_heads(cond @ wv)
    scores = jnp.einsum('bhsd,bhtd->bhst', q, k) / math.sqrt(D / H)
    p = jax.nn.softmax(scores, axis=-1)
    y = jnp.einsum('bhst,bhtd->bhsd', p, v)          # (B, H, S, Dh)
    y = y.reshape(B, S, D)                           # reference's head recombination
    attn = y @ wo + bo
    z = seq + attn
    mean = jnp.mean(z, axis=-1, keepdims=True)
    var = jnp.mean((z - mean) ** 2, axis=-1, keepdims=True)
    return (z - mean) / jnp.sqrt(var + eps) * gamma + beta


if __name__ == "__main__":
    B, S, T, D, H = 2, 8, 16, 128, 4     # D = 128 keeps the output block lane-dense
    key = jax.random.PRNGKey(0)
    ks, kc, kp = jax.random.split(key, 3)
    seq = jax.random.normal(ks, (B, S, D), jnp.float32)
    cond = jax.random.normal(kc, (B, T, D), jnp.float32)
    params = init_params(kp, D)

    out = cross_attention_block(seq, cond, params, num_heads=H, batch_block=1)
    out = jax.block_until_ready(out)

    ref = _reference(seq, cond, params, H)
    assert out.shape == (B, S, D)
    assert jnp.allclose(out, ref, atol=2e-5, rtol=2e-5), (
        "mismatch vs reference, max abs err = %s" % jnp.max(jnp.abs(out - ref)))
    print("KERNEL_OK")
</pallas_src>

<mosaic_0001>
module attributes {stable_mosaic.version = 11 : i64} {
  func.func @_cross_attn_kernel(%arg0: i32, %arg1: memref<1x8x128xf32, #tpu.memory_space<vmem>>, %arg2: memref<1x16x128xf32, #tpu.memory_space<vmem>>, %arg3: memref<128x128xf32, #tpu.memory_space<vmem>>, %arg4: memref<128x128xf32, #tpu.memory_space<vmem>>, %arg5: memref<128x128xf32, #tpu.memory_space<vmem>>, %arg6: memref<128x128xf32, #tpu.memory_space<vmem>>, %arg7: memref<1x128xf32, #tpu.memory_space<vmem>>, %arg8: memref<1x128xf32, #tpu.memory_space<vmem>>, %arg9: memref<1x128xf32, #tpu.memory_space<vmem>>, %arg10: memref<1x8x128xf32, #tpu.memory_space<vmem>>) attributes {dimension_semantics = [#tpu.dimension_semantics<parallel>], iteration_bounds = array<i64: 2>, scalar_prefetch = 0 : i64, scratch_operands = 0 : i64, tpu.core_type = #tpu.core_type<tc>, window_params = [{transform_indices = @transform_0, window_bounds = array<i64: 1, 8, 128>}, {transform_indices = @transform_1, window_bounds = array<i64: 1, 16, 128>}, {pipeline_mode = #tpu.pipeline_mode<synchronous>, transform_indices = @transform_2, window_bounds = array<i64: 128, 128>}, {pipeline_mode = #tpu.pipeline_mode<synchronous>, transform_indices = @transform_3, window_bounds = array<i64: 128, 128>}, {pipeline_mode = #tpu.pipeline_mode<synchronous>, transform_indices = @transform_4, window_bounds = array<i64: 128, 128>}, {pipeline_mode = #tpu.pipeline_mode<synchronous>, transform_indices = @transform_5, window_bounds = array<i64: 128, 128>}, {pipeline_mode = #tpu.pipeline_mode<synchronous>, transform_indices = @transform_6, window_bounds = array<i64: 1, 128>}, {pipeline_mode = #tpu.pipeline_mode<synchronous>, transform_indices = @transform_7, window_bounds = array<i64: 1, 128>}, {pipeline_mode = #tpu.pipeline_mode<synchronous>, transform_indices = @transform_8, window_bounds = array<i64: 1, 128>}, {transform_indices = @transform_9, window_bounds = array<i64: 1, 8, 128>}]} {
    %c0 = arith.constant 0 : index
    %c0_0 = arith.constant 0 : index
    %c0_1 = arith.constant 0 : index
    %0 = vector.load %arg1[%c0, %c0_0, %c0_1] : memref<1x8x128xf32, #tpu.memory_space<vmem>>, vector<1x8x128xf32>
    %1 = vector.shape_cast %0 : vector<1x8x128xf32> to vector<8x128xf32>
    %c0_2 = arith.constant 0 : index
    %c0_3 = arith.constant 0 : index
    %c0_4 = arith.constant 0 : index
    %2 = vector.load %arg2[%c0_2, %c0_3, %c0_4] : memref<1x16x128xf32, #tpu.memory_space<vmem>>, vector<1x16x128xf32>
    %3 = vector.shape_cast %2 : vector<1x16x128xf32> to vector<16x128xf32>
    %c0_5 = arith.constant 0 : index
    %c0_6 = arith.constant 0 : index
    %4 = vector.load %arg3[%c0_5, %c0_6] : memref<128x128xf32, #tpu.memory_space<vmem>>, vector<128x128xf32>
    %cst = arith.constant dense<0.000000e+00> : vector<8x128xf32>
    %5 = tpu.matmul %1, %4, %cst {dimension_numbers = #tpu.dot_dimension_numbers<[1], [0], [0], [1], [0, 0, 1, 1], [], []>} : vector<8x128xf32>, vector<128x128xf32>, vector<8x128xf32> -> vector<8x128xf32>
    %c0_7 = arith.constant 0 : index
    %c0_8 = arith.constant 0 : index
    %6 = vector.load %arg4[%c0_7, %c0_8] : memref<128x128xf32, #tpu.memory_space<vmem>>, vector<128x128xf32>
    %cst_9 = arith.constant dense<0.000000e+00> : vector<16x128xf32>
    %7 = tpu.matmul %3, %6, %cst_9 {dimension_numbers = #tpu.dot_dimension_numbers<[1], [0], [0], [1], [0, 0, 1, 1], [], []>} : vector<16x128xf32>, vector<128x128xf32>, vector<16x128xf32> -> vector<16x128xf32>
    %c0_10 = arith.constant 0 : index
    %c0_11 = arith.constant 0 : index
    %8 = vector.load %arg5[%c0_10, %c0_11] : memref<128x128xf32, #tpu.memory_space<vmem>>, vector<128x128xf32>
    %cst_12 = arith.constant dense<0.000000e+00> : vector<16x128xf32>
    %9 = tpu.matmul %3, %8, %cst_12 {dimension_numbers = #tpu.dot_dimension_numbers<[1], [0], [0], [1], [0, 0, 1, 1], [], []>} : vector<16x128xf32>, vector<128x128xf32>, vector<16x128xf32> -> vector<16x128xf32>
    %10 = tpu.iota {dimensions = array<i32: 0>} : vector<2x8xi32>
    %11 = tpu.iota {dimensions = array<i32: 1>} : vector<2x8xi32>
    %c4_i32 = arith.constant 4 : i32
    %12 = vector.broadcast %c4_i32 : i32 to vector<2x8xi32>
    %13 = arith.muli %10, %12 : vector<2x8xi32>
    %c0_i32 = arith.constant 0 : i32
    %14 = vector.broadcast %c0_i32 : i32 to vector<2x8xi32>
    %15 = arith.addi %13, %14 : vector<2x8xi32>
    %16 = arith.cmpi eq, %11, %15 : vector<2x8xi32>
    %17 = arith.extui %16 : vector<2x8xi1> to vector<2x8xi32>
    %18 = arith.sitofp %17 : vector<2x8xi32> to vector<2x8xf32>
    %c4_i32_13 = arith.constant 4 : i32
    %19 = vector.broadcast %c4_i32_13 : i32 to vector<2x8xi32>
    %20 = arith.muli %10, %19 : vector<2x8xi32>
    %c1_i32 = arith.constant 1 : i32
    %21 = vector.broadcast %c1_i32 : i32 to vector<2x8xi32>
    %22 = arith.addi %20, %21 : vector<2x8xi32>
    %23 = arith.cmpi eq, %11, %22 : vector<2x8xi32>
    %24 = arith.extui %23 : vector<2x8xi1> to vector<2x8xi32>
    %25 = arith.sitofp %24 : vector<2x8xi32> to vector<2x8xf32>
    %c4_i32_14 = arith.constant 4 : i32
    %26 = vector.broadcast %c4_i32_14 : i32 to vector<2x8xi32>
    %27 = arith.muli %10, %26 : vector<2x8xi32>
    %c2_i32 = arith.constant 2 : i32
    %28 = vector.broadcast %c2_i32 : i32 to vector<2x8xi32>
    %29 = arith.addi %27, %28 : vector<2x8xi32>
    %30 = arith.cmpi eq, %11, %29 : vector<2x8xi32>
    %31 = arith.extui %30 : vector<2x8xi1> to vector<2x8xi32>
    %32 = arith.sitofp %31 : vector<2x8xi32> to vector<2x8xf32>
    %c4_i32_15 = arith.constant 4 : i32
    %33 = vector.broadcast %c4_i32_15 : i32 to vector<2x8xi32>
    %34 = arith.muli %10, %33 : vector<2x8xi32>
    %c3_i32 = arith.constant 3 : i32
    %35 = vector.broadcast %c3_i32 : i32 to vector<2x8xi32>
    %36 = arith.addi %34, %35 : vector<2x8xi32>
    %37 = arith.cmpi eq, %11, %36 : vector<2x8xi32>
    %38 = arith.extui %37 : vector<2x8xi1> to vector<2x8xi32>
    %39 = arith.sitofp %38 : vector<2x8xi32> to vector<2x8xf32>
    %c0_16 = arith.constant 0 : index
    %c0_17 = arith.constant 0 : index
    %40 = vector.load %arg7[%c0_16, %c0_17] : memref<1x128xf32, #tpu.memory_space<vmem>>, vector<1x128xf32>
    %c0_18 = arith.constant 0 : index
    %c0_19 = arith.constant 0 : index
    %41 = vector.load %arg8[%c0_18, %c0_19] : memref<1x128xf32, #tpu.memory_space<vmem>>, vector<1x128xf32>
    %c0_20 = arith.constant 0 : index
    %c0_21 = arith.constant 0 : index
    %42 = vector.load %arg9[%c0_20, %c0_21] : memref<1x128xf32, #tpu.memory_space<vmem>>, vector<1x128xf32>
    %43 = vector.extract_strided_slice %5 {offsets = [0, 0], sizes = [8, 32], strides = [1, 1]} : vector<8x128xf32> to vector<8x32xf32>
    %44 = vector.extract_strided_slice %7 {offsets = [0, 0], sizes = [16, 32], strides = [1, 1]} : vector<16x128xf32> to vector<16x32xf32>
    %45 = vector.extract_strided_slice %9 {offsets = [0, 0], sizes = [16, 32], strides = [1, 1]} : vector<16x128xf32> to vector<16x32xf32>
    %cst_22 = arith.constant dense<0.000000e+00> : vector<8x16xf32>
    %46 = tpu.matmul %43, %44, %cst_22 {dimension_numbers = #tpu.dot_dimension_numbers<[1], [1], [0], [0], [0, 0, 1, 0], [], []>} : vector<8x32xf32>, vector<16x32xf32>, vector<8x16xf32> -> vector<8x16xf32>
    %cst_23 = arith.constant 0.176776692 : f32
    %47 = vector.broadcast %cst_23 : f32 to vector<8x16xf32>
    %48 = arith.mulf %46, %47 : vector<8x16xf32>
    %cst_24 = arith.constant dense<0xFF800000> : vector<8xf32>
    %49 = vector.multi_reduction <maximumf>, %48, %cst_24 [1] : vector<8x16xf32> to vector<8xf32>
    %50 = vector.shape_cast %49 : vector<8xf32> to vector<8x1xf32>
    %51 = vector.broadcast %50 : vector<8x1xf32> to vector<8x16xf32>
    %52 = arith.subf %48, %51 : vector<8x16xf32>
    %53 = math.exp %52 : vector<8x16xf32>
    %cst_25 = arith.constant dense<0.000000e+00> : vector<8xf32>
    %54 = vector.multi_reduction <add>, %53, %cst_25 [1] : vector<8x16xf32> to vector<8xf32>
    %55 = vector.shape_cast %54 : vector<8xf32> to vector<8x1xf32>
    %56 = vector.broadcast %55 : vector<8x1xf32> to vector<8x16xf32>
    %57 = arith.divf %53, %56 : vector<8x16xf32>
    %cst_26 = arith.constant dense<0.000000e+00> : vector<8x32xf32>
    %58 = tpu.matmul %57, %45, %cst_26 {dimension_numbers = #tpu.dot_dimension_numbers<[1], [0], [0], [1], [0, 0, 1, 1], [], []>} : vector<8x16xf32>, vector<16x32xf32>, vector<8x32xf32> -> vector<8x32xf32>
    %cst_27 = arith.constant 0.000000e+00 : f32
    %59 = vector.broadcast %cst_27 : f32 to vector<2x128xf32>
    %cst_28 = arith.constant dense<0.000000e+00> : vector<2x32xf32>
    %60 = tpu.matmul %18, %58, %cst_28 {dimension_numbers = #tpu.dot_dimension_numbers<[1], [0], [0], [1], [0, 0, 1, 1], [], []>} : vector<2x8xf32>, vector<8x32xf32>, vector<2x32xf32> -> vector<2x32xf32>
    %c0_29 = arith.constant 0 : index
    %c0_30 = arith.constant 0 : index
    %61 = vector.load %arg6[%c0_29, %c0_30] : memref<128x128xf32, #tpu.memory_space<vmem>>, vector<32x128xf32>
    %cst_31 = arith.constant dense<0.000000e+00> : vector<2x128xf32>
    %62 = tpu.matmul %60, %61, %cst_31 {dimension_numbers = #tpu.dot_dimension_numbers<[1], [0], [0], [1], [0, 0, 1, 1], [], []>} : vector<2x32xf32>, vector<32x128xf32>, vector<2x128xf32> -> vector<2x128xf32>
    %63 = arith.addf %59, %62 : vector<2x128xf32>
    %cst_32 = arith.constant dense<0.000000e+00> : vector<2x32xf32>
    %64 = tpu.matmul %25, %58, %cst_32 {dimension_numbers = #tpu.dot_dimension_numbers<[1], [0], [0], [1], [0, 0, 1, 1], [], []>} : vector<2x8xf32>, vector<8x32xf32>, vector<2x32xf32> -> vector<2x32xf32>
    %c32 = arith.constant 32 : index
    %c0_33 = arith.constant 0 : index
    %65 = vector.load %arg6[%c32, %c0_33] : memref<128x128xf32, #tpu.memory_space<vmem>>, vector<32x128xf32>
    %cst_34 = arith.constant dense<0.000000e+00> : vector<2x128xf32>
    %66 = tpu.matmul %64, %65, %cst_34 {dimension_numbers = #tpu.dot_dimension_numbers<[1], [0], [0], [1], [0, 0, 1, 1], [], []>} : vector<2x32xf32>, vector<32x128xf32>, vector<2x128xf32> -> vector<2x128xf32>
    %67 = arith.addf %63, %66 : vector<2x128xf32>
    %cst_35 = arith.constant dense<0.000000e+00> : vector<2x32xf32>
    %68 = tpu.matmul %32, %58, %cst_35 {dimension_numbers = #tpu.dot_dimension_numbers<[1], [0], [0], [1], [0, 0, 1, 1], [], []>} : vector<2x8xf32>, vector<8x32xf32>, vector<2x32xf32> -> vector<2x32xf32>
    %c64 = arith.constant 64 : index
    %c0_36 = arith.constant 0 : index
    %69 = vector.load %arg6[%c64, %c0_36] : memref<128x128xf32, #tpu.memory_space<vmem>>, vector<32x128xf32>
    %cst_37 = arith.constant dense<0.000000e+00> : vector<2x128xf32>
    %70 = tpu.matmul %68, %69, %cst_37 {dimension_numbers = #tpu.dot_dimension_numbers<[1], [0], [0], [1], [0, 0, 1, 1], [], []>} : vector<2x32xf32>, vector<32x128xf32>, vector<2x128xf32> -> vector<2x128xf32>
    %71 = arith.addf %67, %70 : vector<2x128xf32>
    %cst_38 = arith.constant dense<0.000000e+00> : vector<2x32xf32>
    %72 = tpu.matmul %39, %58, %cst_38 {dimension_numbers = #tpu.dot_dimension_numbers<[1], [0], [0], [1], [0, 0, 1, 1], [], []>} : vector<2x8xf32>, vector<8x32xf32>, vector<2x32xf32> -> vector<2x32xf32>
    %c96 = arith.constant 96 : index
    %c0_39 = arith.constant 0 : index
    %73 = vector.load %arg6[%c96, %c0_39] : memref<128x128xf32, #tpu.memory_space<vmem>>, vector<32x128xf32>
    %cst_40 = arith.constant dense<0.000000e+00> : vector<2x128xf32>
    %74 = tpu.matmul %72, %73, %cst_40 {dimension_numbers = #tpu.dot_dimension_numbers<[1], [0], [0], [1], [0, 0, 1, 1], [], []>} : vector<2x32xf32>, vector<32x128xf32>, vector<2x128xf32> -> vector<2x128xf32>
    %75 = arith.addf %71, %74 : vector<2x128xf32>
    %76 = vector.broadcast %40 : vector<1x128xf32> to vector<2x128xf32>
    %77 = arith.addf %75, %76 : vector<2x128xf32>
    %78 = vector.extract_strided_slice %1 {offsets = [0, 0], sizes = [2, 128], strides = [1, 1]} : vector<8x128xf32> to vector<2x128xf32>
    %79 = arith.addf %78, %77 : vector<2x128xf32>
    %cst_41 = arith.constant dense<0.000000e+00> : vector<2xf32>
    %80 = vector.multi_reduction <add>, %79, %cst_41 [1] : vector<2x128xf32> to vector<2xf32>
    %81 = vector.shape_cast %80 : vector<2xf32> to vector<2x1xf32>
    %cst_42 = arith.constant 1.280000e+02 : f32
    %82 = vector.broadcast %cst_42 : f32 to vector<2x1xf32>
    %83 = arith.divf %81, %82 : vector<2x1xf32>
    %84 = vector.broadcast %83 : vector<2x1xf32> to vector<2x128xf32>
    %85 = arith.subf %79, %84 : vector<2x128xf32>
    %86 = arith.mulf %85, %85 : vector<2x128xf32>
    %cst_43 = arith.constant dense<0.000000e+00> : vector<2xf32>
    %87 = vector.multi_reduction <add>, %86, %cst_43 [1] : vector<2x128xf32> to vector<2xf32>
    %88 = vector.shape_cast %87 : vector<2xf32> to vector<2x1xf32>
    %cst_44 = arith.constant 1.280000e+02 : f32
    %89 = vector.broadcast %cst_44 : f32 to vector<2x1xf32>
    %90 = arith.divf %88, %89 : vector<2x1xf32>
    %cst_45 = arith.constant 9.99999974E-6 : f32
    %91 = vector.broadcast %cst_45 : f32 to vector<2x1xf32>
    %92 = arith.addf %90, %91 : vector<2x1xf32>
    %93 = math.rsqrt %92 : vector<2x1xf32>
    %94 = vector.broadcast %93 : vector<2x1xf32> to vector<2x128xf32>
    %95 = arith.mulf %85, %94 : vector<2x128xf32>
    %96 = vector.broadcast %41 : vector<1x128xf32> to vector<2x128xf32>
    %97 = arith.mulf %95, %96 : vector<2x128xf32>
    %98 = vector.broadcast %42 : vector<1x128xf32> to vector<2x128xf32>
    %99 = arith.addf %97, %98 : vector<2x128xf32>
    %c0_46 = arith.constant 0 : index
    %c0_47 = arith.constant 0 : index
    %c0_48 = arith.constant 0 : index
    %100 = vector.load %arg10[%c0_46, %c0_47, %c0_48] : memref<1x8x128xf32, #tpu.memory_space<vmem>>, vector<1x2x128xf32>
    %101 = vector.shape_cast %100 : vector<1x2x128xf32> to vector<2x128xf32>
    %102 = vector.shape_cast %99 : vector<2x128xf32> to vector<1x2x128xf32>
    tpu.vector_store %arg10[%c0_46, %c0_47, %c0_48], %102 {strides = array<i32>} : memref<1x8x128xf32, #tpu.memory_space<vmem>>, vector<1x2x128xf32>,
    %103 = vector.extract_strided_slice %5 {offsets = [0, 32], sizes = [8, 32], strides = [1, 1]} : vector<8x128xf32> to vector<8x32xf32>
    %104 = vector.extract_strided_slice %7 {offsets = [0, 32], sizes = [16, 32], strides = [1, 1]} : vector<16x128xf32> to vector<16x32xf32>
    %105 = vector.extract_strided_slice %9 {offsets = [0, 32], sizes = [16, 32], strides = [1, 1]} : vector<16x128xf32> to vector<16x32xf32>
    %cst_49 = arith.constant dense<0.000000e+00> : vector<8x16xf32>
    %106 = tpu.matmul %103, %104, %cst_49 {dimension_numbers = #tpu.dot_dimension_numbers<[1], [1], [0], [0], [0, 0, 1, 0], [], []>} : vector<8x32xf32>, vector<16x32xf32>, vector<8x16xf32> -> vector<8x16xf32>
    %cst_50 = arith.constant 0.176776692 : f32
    %107 = vector.broadcast %cst_50 : f32 to vector<8x16xf32>
    %108 = arith.mulf %106, %107 : vector<8x16xf32>
    %cst_51 = arith.constant dense<0xFF800000> : vector<8xf32>
    %109 = vector.multi_reduction <maximumf>, %108, %cst_51 [1] : vector<8x16xf32> to vector<8xf32>
    %110 = vector.shape_cast %109 : vector<8xf32> to vector<8x1xf32>
    %111 = vector.broadcast %110 : vector<8x1xf32> to vector<8x16xf32>
    %112 = arith.subf %108, %111 : vector<8x16xf32>
    %113 = math.exp %112 : vector<8x16xf32>
    %cst_52 = arith.constant dense<0.000000e+00> : vector<8xf32>
    %114 = vector.multi_reduction <add>, %113, %cst_52 [1] : vector<8x16xf32> to vector<8xf32>
    %115 = vector.shape_cast %114 : vector<8xf32> to vector<8x1xf32>
    %116 = vector.broadcast %115 : vector<8x1xf32> to vector<8x16xf32>
    %117 = arith.divf %113, %116 : vector<8x16xf32>
    %cst_53 = arith.constant dense<0.000000e+00> : vector<8x32xf32>
    %118 = tpu.matmul %117, %105, %cst_53 {dimension_numbers = #tpu.dot_dimension_numbers<[1], [0], [0], [1], [0, 0, 1, 1], [], []>} : vector<8x16xf32>, vector<16x32xf32>, vector<8x32xf32> -> vector<8x32xf32>
    %cst_54 = arith.constant 0.000000e+00 : f32
    %119 = vector.broadcast %cst_54 : f32 to vector<2x128xf32>
    %cst_55 = arith.constant dense<0.000000e+00> : vector<2x32xf32>
    %120 = tpu.matmul %18, %118, %cst_55 {dimension_numbers = #tpu.dot_dimension_numbers<[1], [0], [0], [1], [0, 0, 1, 1], [], []>} : vector<2x8xf32>, vector<8x32xf32>, vector<2x32xf32> -> vector<2x32xf32>
    %c0_56 = arith.constant 0 : index
    %c0_57 = arith.constant 0 : index
    %121 = vector.load %arg6[%c0_56, %c0_57] : memref<128x128xf32, #tpu.memory_space<vmem>>, vector<32x128xf32>
    %cst_58 = arith.constant dense<0.000000e+00> : vector<2x128xf32>
    %122 = tpu.matmul %120, %121, %cst_58 {dimension_numbers = #tpu.dot_dimension_numbers<[1], [0], [0], [1], [0, 0, 1, 1], [], []>} : vector<2x32xf32>, vector<32x128xf32>, vector<2x128xf32> -> vector<2x128xf32>
    %123 = arith.addf %119, %122 : vector<2x128xf32>
    %cst_59 = arith.constant dense<0.000000e+00> : vector<2x32xf32>
    %124 = tpu.matmul %25, %118, %cst_59 {dimension_numbers = #tpu.dot_dimension_numbers<[1], [0], [0], [1], [0, 0, 1, 1], [], []>} : vector<2x8xf32>, vector<8x32xf32>, vector<2x32xf32> -> vector<2x32xf32>
    %c32_60 = arith.constant 32 : index
    %c0_61 = arith.constant 0 : index
    %125 = vector.load %arg6[%c32_60, %c0_61] : memref<128x128xf32, #tpu.memory_space<vmem>>, vector<32x128xf32>
    %cst_62 = arith.constant dense<0.000000e+00> : vector<2x128xf32>
    %126 = tpu.matmul %124, %125, %cst_62 {dimension_numbers = #tpu.dot_dimension_numbers<[1], [0], [0], [1], [0, 0, 1, 1], [], []>} : vector<2x32xf32>, vector<32x128xf32>, vector<2x128xf32> -> vector<2x128xf32>
    %127 = arith.addf %123, %126 : vector<2x128xf32>
    %cst_63 = arith.constant dense<0.000000e+00> : vector<2x32xf32>
    %128 = tpu.matmul %32, %118, %cst_63 {dimension_numbers = #tpu.dot_dimension_numbers<[1], [0], [0], [1], [0, 0, 1, 1], [], []>} : vector<2x8xf32>, vector<8x32xf32>, vector<2x32xf32> -> vector<2x32xf32>
    %c64_64 = arith.constant 64 : index
    %c0_65 = arith.constant 0 : index
    %129 = vector.load %arg6[%c64_64, %c0_65] : memref<128x128xf32, #tpu.memory_space<vmem>>, vector<32x128xf32>
    %cst_66 = arith.constant dense<0.000000e+00> : vector<2x128xf32>
    %130 = tpu.matmul %128, %129, %cst_66 {dimension_numbers = #tpu.dot_dimension_numbers<[1], [0], [0], [1], [0, 0, 1, 1], [], []>} : vector<2x32xf32>, vector<32x128xf32>, vector<2x128xf32> -> vector<2x128xf32>
    %131 = arith.addf %127, %130 : vector<2x128xf32>
    %cst_67 = arith.constant dense<0.000000e+00> : vector<2x32xf32>
    %132 = tpu.matmul %39, %118, %cst_67 {dimension_numbers = #tpu.dot_dimension_numbers<[1], [0], [0], [1], [0, 0, 1, 1], [], []>} : vector<2x8xf32>, vector<8x32xf32>, vector<2x32xf32> -> vector<2x32xf32>
    %c96_68 = arith.constant 96 : index
    %c0_69 = arith.constant 0 : index
    %133 = vector.load %arg6[%c96_68, %c0_69] : memref<128x128xf32, #tpu.memory_space<vmem>>, vector<32x128xf32>
    %cst_70 = arith.constant dense<0.000000e+00> : vector<2x128xf32>
    %134 = tpu.matmul %132, %133, %cst_70 {dimension_numbers = #tpu.dot_dimension_numbers<[1], [0], [0], [1], [0, 0, 1, 1], [], []>} : vector<2x32xf32>, vector<32x128xf32>, vector<2x128xf32> -> vector<2x128xf32>
    %135 = arith.addf %131, %134 : vector<2x128xf32>
    %136 = vector.broadcast %40 : vector<1x128xf32> to vector<2x128xf32>
    %137 = arith.addf %135, %136 : vector<2x128xf32>
    %138 = vector.extract_strided_slice %1 {offsets = [2, 0], sizes = [2, 128], strides = [1, 1]} : vector<8x128xf32> to vector<2x128xf32>
    %139 = arith.addf %138, %137 : vector<2x128xf32>
    %cst_71 = arith.constant dense<0.000000e+00> : vector<2xf32>
    %140 = vector.multi_reduction <add>, %139, %cst_71 [1] : vector<2x128xf32> to vector<2xf32>
    %141 = vector.shape_cast %140 : vector<2xf32> to vector<2x1xf32>
    %cst_72 = arith.constant 1.280000e+02 : f32
    %142 = vector.broadcast %cst_72 : f32 to vector<2x1xf32>
    %143 = arith.divf %141, %142 : vector<2x1xf32>
    %144 = vector.broadcast %143 : vector<2x1xf32> to vector<2x128xf32>
    %145 = arith.subf %139, %144 : vector<2x128xf32>
    %146 = arith.mulf %145, %145 : vector<2x128xf32>
    %cst_73 = arith.constant dense<0.000000e+00> : vector<2xf32>
    %147 = vector.multi_reduction <add>, %146, %cst_73 [1] : vector<2x128xf32> to vector<2xf32>
    %148 = vector.shape_cast %147 : vector<2xf32> to vector<2x1xf32>
    %cst_74 = arith.constant 1.280000e+02 : f32
    %149 = vector.broadcast %cst_74 : f32 to vector<2x1xf32>
    %150 = arith.divf %148, %149 : vector<2x1xf32>
    %cst_75 = arith.constant 9.99999974E-6 : f32
    %151 = vector.broadcast %cst_75 : f32 to vector<2x1xf32>
    %152 = arith.addf %150, %151 : vector<2x1xf32>
    %153 = math.rsqrt %152 : vector<2x1xf32>
    %154 = vector.broadcast %153 : vector<2x1xf32> to vector<2x128xf32>
    %155 = arith.mulf %145, %154 : vector<2x128xf32>
    %156 = vector.broadcast %41 : vector<1x128xf32> to vector<2x128xf32>
    %157 = arith.mulf %155, %156 : vector<2x128xf32>
    %158 = vector.broadcast %42 : vector<1x128xf32> to vector<2x128xf32>
    %159 = arith.addf %157, %158 : vector<2x128xf32>
    %c0_76 = arith.constant 0 : index
    %c2 = arith.constant 2 : index
    %c0_77 = arith.constant 0 : index
    %160 = vector.load %arg10[%c0_76, %c2, %c0_77] : memref<1x8x128xf32, #tpu.memory_space<vmem>>, vector<1x2x128xf32>
    %161 = vector.shape_cast %160 : vector<1x2x128xf32> to vector<2x128xf32>
    %162 = vector.shape_cast %159 : vector<2x128xf32> to vector<1x2x128xf32>
    tpu.vector_store %arg10[%c0_76, %c2, %c0_77], %162 {strides = array<i32>} : memref<1x8x128xf32, #tpu.memory_space<vmem>>, vector<1x2x128xf32>,
    %163 = vector.extract_strided_slice %5 {offsets = [0, 64], sizes = [8, 32], strides = [1, 1]} : vector<8x128xf32> to vector<8x32xf32>
    %164 = vector.extract_strided_slice %7 {offsets = [0, 64], sizes = [16, 32], strides = [1, 1]} : vector<16x128xf32> to vector<16x32xf32>
    %165 = vector.extract_strided_slice %9 {offsets = [0, 64], sizes = [16, 32], strides = [1, 1]} : vector<16x128xf32> to vector<16x32xf32>
    %cst_78 = arith.constant dense<0.000000e+00> : vector<8x16xf32>
    %166 = tpu.matmul %163, %164, %cst_78 {dimension_numbers = #tpu.dot_dimension_numbers<[1], [1], [0], [0], [0, 0, 1, 0], [], []>} : vector<8x32xf32>, vector<16x32xf32>, vector<8x16xf32> -> vector<8x16xf32>
    %cst_79 = arith.constant 0.176776692 : f32
    %167 = vector.broadcast %cst_79 : f32 to vector<8x16xf32>
    %168 = arith.mulf %166, %167 : vector<8x16xf32>
    %cst_80 = arith.constant dense<0xFF800000> : vector<8xf32>
    %169 = vector.multi_reduction <maximumf>, %168, %cst_80 [1] : vector<8x16xf32> to vector<8xf32>
    %170 = vector.shape_cast %169 : vector<8xf32> to vector<8x1xf32>
    %171 = vector.broadcast %170 : vector<8x1xf32> to vector<8x16xf32>
    %172 = arith.subf %168, %171 : vector<8x16xf32>
    %173 = math.exp %172 : vector<8x16xf32>
    %cst_81 = arith.constant dense<0.000000e+00> : vector<8xf32>
    %174 = vector.multi_reduction <add>, %173, %cst_81 [1] : vector<8x16xf32> to vector<8xf32>
    %175 = vector.shape_cast %174 : vector<8xf32> to vector<8x1xf32>
    %176 = vector.broadcast %175 : vector<8x1xf32> to vector<8x16xf32>
    %177 = arith.divf %173, %176 : vector<8x16xf32>
    %cst_82 = arith.constant dense<0.000000e+00> : vector<8x32xf32>
    %178 = tpu.matmul %177, %165, %cst_82 {dimension_numbers = #tpu.dot_dimension_numbers<[1], [0], [0], [1], [0, 0, 1, 1], [], []>} : vector<8x16xf32>, vector<16x32xf32>, vector<8x32xf32> -> vector<8x32xf32>
    %cst_83 = arith.constant 0.000000e+00 : f32
    %179 = vector.broadcast %cst_83 : f32 to vector<2x128xf32>
    %cst_84 = arith.constant dense<0.000000e+00> : vector<2x32xf32>
    %180 = tpu.matmul %18, %178, %cst_84 {dimension_numbers = #tpu.dot_dimension_numbers<[1], [0], [0], [1], [0, 0, 1, 1], [], []>} : vector<2x8xf32>, vector<8x32xf32>, vector<2x32xf32> -> vector<2x32xf32>
    %c0_85 = arith.constant 0 : index
    %c0_86 = arith.constant 0 : index
    %181 = vector.load %arg6[%c0_85, %c0_86] : memref<128x128xf32, #tpu.memory_space<vmem>>, vector<32x128xf32>
    %cst_87 = arith.constant dense<0.000000e+00> : vector<2x128xf32>
    %182 = tpu.matmul %180, %181, %cst_87 {dimension_numbers = #tpu.dot_dimension_numbers<[1], [0], [0], [1], [0, 0, 1, 1], [], []>} : vector<2x32xf32>, vector<32x128xf32>, vector<2x128xf32> -> vector<2x128xf32>
    %183 = arith.addf %179, %182 : vector<2x128xf32>
    %cst_88 = arith.constant dense<0.000000e+00> : vector<2x32xf32>
    %184 = tpu.matmul %25, %178, %cst_88 {dimension_numbers = #tpu.dot_dimension_numbers<[1], [0], [0], [1], [0, 0, 1, 1], [], []>} : vector<2x8xf32>, vector<8x32xf32>, vector<2x32xf32> -> vector<2x32xf32>
    %c32_89 = arith.constant 32 : index
    %c0_90 = arith.constant 0 : index
    %185 = vector.load %arg6[%c32_89, %c0_90] : memref<128x128xf32, #tpu.memory_space<vmem>>, vector<32x128xf32>
    %cst_91 = arith.constant dense<0.000000e+00> : vector<2x128xf32>
    %186 = tpu.matmul %184, %185, %cst_91 {dimension_numbers = #tpu.dot_dimension_numbers<[1], [0], [0], [1], [0, 0, 1, 1], [], []>} : vector<2x32xf32>, vector<32x128xf32>, vector<2x128xf32> -> vector<2x128xf32>
    %187 = arith.addf %183, %186 : vector<2x128xf32>
    %cst_92 = arith.constant dense<0.000000e+00> : vector<2x32xf32>
    %188 = tpu.matmul %32, %178, %cst_92 {dimension_numbers = #tpu.dot_dimension_numbers<[1], [0], [0], [1], [0, 0, 1, 1], [], []>} : vector<2x8xf32>, vector<8x32xf32>, vector<2x32xf32> -> vector<2x32xf32>
    %c64_93 = arith.constant 64 : index
    %c0_94 = arith.constant 0 : index
    %189 = vector.load %arg6[%c64_93, %c0_94] : memref<128x128xf32, #tpu.memory_space<vmem>>, vector<32x128xf32>
    %cst_95 = arith.constant dense<0.000000e+00> : vector<2x128xf32>
    %190 = tpu.matmul %188, %189, %cst_95 {dimension_numbers = #tpu.dot_dimension_numbers<[1], [0], [0], [1], [0, 0, 1, 1], [], []>} : vector<2x32xf32>, vector<32x128xf32>, vector<2x128xf32> -> vector<2x128xf32>
    %191 = arith.addf %187, %190 : vector<2x128xf32>
    %cst_96 = arith.constant dense<0.000000e+00> : vector<2x32xf32>
    %192 = tpu.matmul %39, %178, %cst_96 {dimension_numbers = #tpu.dot_dimension_numbers<[1], [0], [0], [1], [0, 0, 1, 1], [], []>} : vector<2x8xf32>, vector<8x32xf32>, vector<2x32xf32> -> vector<2x32xf32>
    %c96_97 = arith.constant 96 : index
    %c0_98 = arith.constant 0 : index
    %193 = vector.load %arg6[%c96_97, %c0_98] : memref<128x128xf32, #tpu.memory_space<vmem>>, vector<32x128xf32>
    %cst_99 = arith.constant dense<0.000000e+00> : vector<2x128xf32>
    %194 = tpu.matmul %192, %193, %cst_99 {dimension_numbers = #tpu.dot_dimension_numbers<[1], [0], [0], [1], [0, 0, 1, 1], [], []>} : vector<2x32xf32>, vector<32x128xf32>, vector<2x128xf32> -> vector<2x128xf32>
    %195 = arith.addf %191, %194 : vector<2x128xf32>
    %196 = vector.broadcast %40 : vector<1x128xf32> to vector<2x128xf32>
    %197 = arith.addf %195, %196 : vector<2x128xf32>
    %198 = vector.extract_strided_slice %1 {offsets = [4, 0], sizes = [2, 128], strides = [1, 1]} : vector<8x128xf32> to vector<2x128xf32>
    %199 = arith.addf %198, %197 : vector<2x128xf32>
    %cst_100 = arith.constant dense<0.000000e+00> : vector<2xf32>
    %200 = vector.multi_reduction <add>, %199, %cst_100 [1] : vector<2x128xf32> to vector<2xf32>
    %201 = vector.shape_cast %200 : vector<2xf32> to vector<2x1xf32>
    %cst_101 = arith.constant 1.280000e+02 : f32
    %202 = vector.broadcast %cst_101 : f32 to vector<2x1xf32>
    %203 = arith.divf %201, %202 : vector<2x1xf32>
    %204 = vector.broadcast %203 : vector<2x1xf32> to vector<2x128xf32>
    %205 = arith.subf %199, %204 : vector<2x128xf32>
    %206 = arith.mulf %205, %205 : vector<2x128xf32>
    %cst_102 = arith.constant dense<0.000000e+00> : vector<2xf32>
    %207 = vector.multi_reduction <add>, %206, %cst_102 [1] : vector<2x128xf32> to vector<2xf32>
    %208 = vector.shape_cast %207 : vector<2xf32> to vector<2x1xf32>
    %cst_103 = arith.constant 1.280000e+02 : f32
    %209 = vector.broadcast %cst_103 : f32 to vector<2x1xf32>
    %210 = arith.divf %208, %209 : vector<2x1xf32>
    %cst_104 = arith.constant 9.99999974E-6 : f32
    %211 = vector.broadcast %cst_104 : f32 to vector<2x1xf32>
    %212 = arith.addf %210, %211 : vector<2x1xf32>
    %213 = math.rsqrt %212 : vector<2x1xf32>
    %214 = vector.broadcast %213 : vector<2x1xf32> to vector<2x128xf32>
    %215 = arith.mulf %205, %214 : vector<2x128xf32>
    %216 = vector.broadcast %41 : vector<1x128xf32> to vector<2x128xf32>
    %217 = arith.mulf %215, %216 : vector<2x128xf32>
    %218 = vector.broadcast %42 : vector<1x128xf32> to vector<2x128xf32>
    %219 = arith.addf %217, %218 : vector<2x128xf32>
    %c0_105 = arith.constant 0 : index
    %c4 = arith.constant 4 : index
    %c0_106 = arith.constant 0 : index
    %220 = vector.load %arg10[%c0_105, %c4, %c0_106] : memref<1x8x128xf32, #tpu.memory_space<vmem>>, vector<1x2x128xf32>
    %221 = vector.shape_cast %220 : vector<1x2x128xf32> to vector<2x128xf32>
    %222 = vector.shape_cast %219 : vector<2x128xf32> to vector<1x2x128xf32>
    tpu.vector_store %arg10[%c0_105, %c4, %c0_106], %222 {strides = array<i32>} : memref<1x8x128xf32, #tpu.memory_space<vmem>>, vector<1x2x128xf32>,
    %223 = vector.extract_strided_slice %5 {offsets = [0, 96], sizes = [8, 32], strides = [1, 1]} : vector<8x128xf32> to vector<8x32xf32>
    %224 = vector.extract_strided_slice %7 {offsets = [0, 96], sizes = [16, 32], strides = [1, 1]} : vector<16x128xf32> to vector<16x32xf32>
    %225 = vector.extract_strided_slice %9 {offsets = [0, 96], sizes = [16, 32], strides = [1, 1]} : vector<16x128xf32> to vector<16x32xf32>
    %cst_107 = arith.constant dense<0.000000e+00> : vector<8x16xf32>
    %226 = tpu.matmul %223, %224, %cst_107 {dimension_numbers = #tpu.dot_dimension_numbers<[1], [1], [0], [0], [0, 0, 1, 0], [], []>} : vector<8x32xf32>, vector<16x32xf32>, vector<8x16xf32> -> vector<8x16xf32>
    %cst_108 = arith.constant 0.176776692 : f32
    %227 = vector.broadcast %cst_108 : f32 to vector<8x16xf32>
    %228 = arith.mulf %226, %227 : vector<8x16xf32>
    %cst_109 = arith.constant dense<0xFF800000> : vector<8xf32>
    %229 = vector.multi_reduction <maximumf>, %228, %cst_109 [1] : vector<8x16xf32> to vector<8xf32>
    %230 = vector.shape_cast %229 : vector<8xf32> to vector<8x1xf32>
    %231 = vector.broadcast %230 : vector<8x1xf32> to vector<8x16xf32>
    %232 = arith.subf %228, %231 : vector<8x16xf32>
    %233 = math.exp %232 : vector<8x16xf32>
    %cst_110 = arith.constant dense<0.000000e+00> : vector<8xf32>
    %234 = vector.multi_reduction <add>, %233, %cst_110 [1] : vector<8x16xf32> to vector<8xf32>
    %235 = vector.shape_cast %234 : vector<8xf32> to vector<8x1xf32>
    %236 = vector.broadcast %235 : vector<8x1xf32> to vector<8x16xf32>
    %237 = arith.divf %233, %236 : vector<8x16xf32>
    %cst_111 = arith.constant dense<0.000000e+00> : vector<8x32xf32>
    %238 = tpu.matmul %237, %225, %cst_111 {dimension_numbers = #tpu.dot_dimension_numbers<[1], [0], [0], [1], [0, 0, 1, 1], [], []>} : vector<8x16xf32>, vector<16x32xf32>, vector<8x32xf32> -> vector<8x32xf32>
    %cst_112 = arith.constant 0.000000e+00 : f32
    %239 = vector.broadcast %cst_112 : f32 to vector<2x128xf32>
    %cst_113 = arith.constant dense<0.000000e+00> : vector<2x32xf32>
    %240 = tpu.matmul %18, %238, %cst_113 {dimension_numbers = #tpu.dot_dimension_numbers<[1], [0], [0], [1], [0, 0, 1, 1], [], []>} : vector<2x8xf32>, vector<8x32xf32>, vector<2x32xf32> -> vector<2x32xf32>
    %c0_114 = arith.constant 0 : index
    %c0_115 = arith.constant 0 : index
    %241 = vector.load %arg6[%c0_114, %c0_115] : memref<128x128xf32, #tpu.memory_space<vmem>>, vector<32x128xf32>
    %cst_116 = arith.constant dense<0.000000e+00> : vector<2x128xf32>
    %242 = tpu.matmul %240, %241, %cst_116 {dimension_numbers = #tpu.dot_dimension_numbers<[1], [0], [0], [1], [0, 0, 1, 1], [], []>} : vector<2x32xf32>, vector<32x128xf32>, vector<2x128xf32> -> vector<2x128xf32>
    %243 = arith.addf %239, %242 : vector<2x128xf32>
    %cst_117 = arith.constant dense<0.000000e+00> : vector<2x32xf32>
    %244 = tpu.matmul %25, %238, %cst_117 {dimension_numbers = #tpu.dot_dimension_numbers<[1], [0], [0], [1], [0, 0, 1, 1], [], []>} : vector<2x8xf32>, vector<8x32xf32>, vector<2x32xf32> -> vector<2x32xf32>
    %c32_118 = arith.constant 32 : index
    %c0_119 = arith.constant 0 : index
    %245 = vector.load %arg6[%c32_118, %c0_119] : memref<128x128xf32, #tpu.memory_space<vmem>>, vector<32x128xf32>
    %cst_120 = arith.constant dense<0.000000e+00> : vector<2x128xf32>
    %246 = tpu.matmul %244, %245, %cst_120 {dimension_numbers = #tpu.dot_dimension_numbers<[1], [0], [0], [1], [0, 0, 1, 1], [], []>} : vector<2x32xf32>, vector<32x128xf32>, vector<2x128xf32> -> vector<2x128xf32>
    %247 = arith.addf %243, %246 : vector<2x128xf32>
    %cst_121 = arith.constant dense<0.000000e+00> : vector<2x32xf32>
    %248 = tpu.matmul %32, %238, %cst_121 {dimension_numbers = #tpu.dot_dimension_numbers<[1], [0], [0], [1], [0, 0, 1, 1], [], []>} : vector<2x8xf32>, vector<8x32xf32>, vector<2x32xf32> -> vector<2x32xf32>
    %c64_122 = arith.constant 64 : index
    %c0_123 = arith.constant 0 : index
    %249 = vector.load %arg6[%c64_122, %c0_123] : memref<128x128xf32, #tpu.memory_space<vmem>>, vector<32x128xf32>
    %cst_124 = arith.constant dense<0.000000e+00> : vector<2x128xf32>
    %250 = tpu.matmul %248, %249, %cst_124 {dimension_numbers = #tpu.dot_dimension_numbers<[1], [0], [0], [1], [0, 0, 1, 1], [], []>} : vector<2x32xf32>, vector<32x128xf32>, vector<2x128xf32> -> vector<2x128xf32>
    %251 = arith.addf %247, %250 : vector<2x128xf32>
    %cst_125 = arith.constant dense<0.000000e+00> : vector<2x32xf32>
    %252 = tpu.matmul %39, %238, %cst_125 {dimension_numbers = #tpu.dot_dimension_numbers<[1], [0], [0], [1], [0, 0, 1, 1], [], []>} : vector<2x8xf32>, vector<8x32xf32>, vector<2x32xf32> -> vector<2x32xf32>
    %c96_126 = arith.constant 96 : index
    %c0_127 = arith.constant 0 : index
    %253 = vector.load %arg6[%c96_126, %c0_127] : memref<128x128xf32, #tpu.memory_space<vmem>>, vector<32x128xf32>
    %cst_128 = arith.constant dense<0.000000e+00> : vector<2x128xf32>
    %254 = tpu.matmul %252, %253, %cst_128 {dimension_numbers = #tpu.dot_dimension_numbers<[1], [0], [0], [1], [0, 0, 1, 1], [], []>} : vector<2x32xf32>, vector<32x128xf32>, vector<2x128xf32> -> vector<2x128xf32>
    %255 = arith.addf %251, %254 : vector<2x128xf32>
    %256 = vector.broadcast %40 : vector<1x128xf32> to vector<2x128xf32>
    %257 = arith.addf %255, %256 : vector<2x128xf32>
    %258 = vector.extract_strided_slice %1 {offsets = [6, 0], sizes = [2, 128], strides = [1, 1]} : vector<8x128xf32> to vector<2x128xf32>
    %259 = arith.addf %258, %257 : vector<2x128xf32>
    %cst_129 = arith.constant dense<0.000000e+00> : vector<2xf32>
    %260 = vector.multi_reduction <add>, %259, %cst_129 [1] : vector<2x128xf32> to vector<2xf32>
    %261 = vector.shape_cast %260 : vector<2xf32> to vector<2x1xf32>
    %cst_130 = arith.constant 1.280000e+02 : f32
    %262 = vector.broadcast %cst_130 : f32 to vector<2x1xf32>
    %263 = arith.divf %261, %262 : vector<2x1xf32>
    %264 = vector.broadcast %263 : vector<2x1xf32> to vector<2x128xf32>
    %265 = arith.subf %259, %264 : vector<2x128xf32>
    %266 = arith.mulf %265, %265 : vector<2x128xf32>
    %cst_131 = arith.constant dense<0.000000e+00> : vector<2xf32>
    %267 = vector.multi_reduction <add>, %266, %cst_131 [1] : vector<2x128xf32> to vector<2xf32>
    %268 = vector.shape_cast %267 : vector<2xf32> to vector<2x1xf32>
    %cst_132 = arith.constant 1.280000e+02 : f32
    %269 = vector.broadcast %cst_132 : f32 to vector<2x1xf32>
    %270 = arith.divf %268, %269 : vector<2x1xf32>
    %cst_133 = arith.constant 9.99999974E-6 : f32
    %271 = vector.broadcast %cst_133 : f32 to vector<2x1xf32>
    %272 = arith.addf %270, %271 : vector<2x1xf32>
    %273 = math.rsqrt %272 : vector<2x1xf32>
    %274 = vector.broadcast %273 : vector<2x1xf32> to vector<2x128xf32>
    %275 = arith.mulf %265, %274 : vector<2x128xf32>
    %276 = vector.broadcast %41 : vector<1x128xf32> to vector<2x128xf32>
    %277 = arith.mulf %275, %276 : vector<2x128xf32>
    %278 = vector.broadcast %42 : vector<1x128xf32> to vector<2x128xf32>
    %279 = arith.addf %277, %278 : vector<2x128xf32>
    %c0_134 = arith.constant 0 : index
    %c6 = arith.constant 6 : index
    %c0_135 = arith.constant 0 : index
    %280 = vector.load %arg10[%c0_134, %c6, %c0_135] : memref<1x8x128xf32, #tpu.memory_space<vmem>>, vector<1x2x128xf32>
    %281 = vector.shape_cast %280 : vector<1x2x128xf32> to vector<2x128xf32>
    %282 = vector.shape_cast %279 : vector<2x128xf32> to vector<1x2x128xf32>
    tpu.vector_store %arg10[%c0_134, %c6, %c0_135], %282 {strides = array<i32>} : memref<1x8x128xf32, #tpu.memory_space<vmem>>, vector<1x2x128xf32>,
    return
  }
  func.func @transform_0(%arg0: i32) -> (i32, i32, i32) {
    %c0_i32 = arith.constant 0 : i32
    %c0_i32_0 = arith.constant 0 : i32
    %c0_i32_1 = arith.constant 0 : i32
    return %arg0, %c0_i32, %c0_i32_0 : i32, i32, i32
  }
  func.func @transform_1(%arg0: i32) -> (i32, i32, i32) {
    %c0_i32 = arith.constant 0 : i32
    %c0_i32_0 = arith.constant 0 : i32
    %c0_i32_1 = arith.constant 0 : i32
    return %arg0, %c0_i32, %c0_i32_0 : i32, i32, i32
  }
  func.func @transform_2(%arg0: i32) -> (i32, i32) {
    %c0_i32 = arith.constant 0 : i32
    %c0_i32_0 = arith.constant 0 : i32
    %c0_i32_1 = arith.constant 0 : i32
    return %c0_i32, %c0_i32_0 : i32, i32
  }
  func.func @transform_3(%arg0: i32) -> (i32, i32) {
    %c0_i32 = arith.constant 0 : i32
    %c0_i32_0 = arith.constant 0 : i32
    %c0_i32_1 = arith.constant 0 : i32
    return %c0_i32, %c0_i32_0 : i32, i32
  }
  func.func @transform_4(%arg0: i32) -> (i32, i32) {
    %c0_i32 = arith.constant 0 : i32
    %c0_i32_0 = arith.constant 0 : i32
    %c0_i32_1 = arith.constant 0 : i32
    return %c0_i32, %c0_i32_0 : i32, i32
  }
  func.func @transform_5(%arg0: i32) -> (i32, i32) {
    %c0_i32 = arith.constant 0 : i32
    %c0_i32_0 = arith.constant 0 : i32
    %c0_i32_1 = arith.constant 0 : i32
    return %c0_i32, %c0_i32_0 : i32, i32
  }
  func.func @transform_6(%arg0: i32) -> (i32, i32) {
    %c0_i32 = arith.constant 0 : i32
    %c0_i32_0 = arith.constant 0 : i32
    %c0_i32_1 = arith.constant 0 : i32
    return %c0_i32, %c0_i32_0 : i32, i32
  }
  func.func @transform_7(%arg0: i32) -> (i32, i32) {
    %c0_i32 = arith.constant 0 : i32
    %c0_i32_0 = arith.constant 0 : i32
    %c0_i32_1 = arith.constant 0 : i32
    return %c0_i32, %c0_i32_0 : i32, i32
  }
  func.func @transform_8(%arg0: i32) -> (i32, i32) {
    %c0_i32 = arith.constant 0 : i32
    %c0_i32_0 = arith.constant 0 : i32
    %c0_i32_1 = arith.constant 0 : i32
    return %c0_i32, %c0_i32_0 : i32, i32
  }
  func.func @transform_9(%arg0: i32) -> (i32, i32, i32) {
    %c0_i32 = arith.constant 0 : i32
    %c0_i32_0 = arith.constant 0 : i32
    %c0_i32_1 = arith.constant 0 : i32
    return %arg0, %c0_i32, %c0_i32_0 : i32, i32, i32
  }
}

</mosaic_0001>

<bundles_post_ra>
// kernel: tpu_custom_call.1
= control target key start
LH: loop header
LB: loop body
LE: loop exit
PB: predicated region body
PF: predicated region fallthrough
CT: control target
= control target key end

     0   :  { %s6143_s0 = inlined_call_operand.hbm [shape: f32[2,8,128], index: 0, kind: input, shape index: {}]   ;;  %s6144_s1 = inlined_call_operand.hbm [shape: f32[2,16,128], index: 1, kind: input, shape index: {}]   ;;  %s6145_s2 = inlined_call_operand.hbm [shape: f32[128,128], index: 2, kind: input, shape index: {}]   ;;  %s6146_s3 = inlined_call_operand.hbm [shape: f32[128,128], index: 3, kind: input, shape index: {}]   ;;  %s6147_s4 = inlined_call_operand.hbm [shape: f32[128,128], index: 4, kind: input, shape index: {}]   ;;  %s6148_s5 = inlined_call_operand.hbm [shape: f32[128,128], index: 5, kind: input, shape index: {}]   ;;  %s6149_s6 = inlined_call_operand.vmem [shape: f32[1,128], index: 6, kind: input, shape index: {}]   ;;  %s6150_s7 = inlined_call_operand.vmem [shape: f32[1,128], index: 7, kind: input, shape index: {}]   ;;  %s6151_s8 = inlined_call_operand.vmem [shape: f32[1,128], index: 8, kind: input, shape index: {}]   ;;  %s6152_s9 = inlined_call_operand.hbm [shape: f32[2,8,128], index: 9, kind: output, shape index: {}]  }
   0x1   :  { %6159 = sst [smem:[#allocation20_spill]] %s6143_s0 }
   0x2   :  { %6160 = sst [smem:[#allocation21_spill]] %s6145_s2 }
   0x3   :  { %6161 = sst [smem:[#allocation22_spill]] %s6146_s3 }
   0x4   :  { %6162 = sst [smem:[#allocation23_spill]] %s6147_s4 }
   0x5   :  { %6163 = sst [smem:[#allocation24_spill]] %s6152_s9 }
   0x6   :  { %14 = vsyncpa [#allocation3], 0 }
   0x7   :  { %16 = vsyncpa [#allocation3 + $0x1], 0 }
   0x8   :  { %17 = vsyncpa [#allocation6], 0 }
   0x9   :  { %19 = vsyncpa [#allocation6 + $0x1], 0 }
   0xa   :  { %20 = vsyncpa [#allocation9], 0 }
   0xb   :  { %21 = vsyncpa [#allocation12], 0 }
   0xc   :  { %22 = vsyncpa [#allocation4], 0 }
   0xd   :  { %24 = vsyncpa [#allocation4 + $0x1], 0  ;;  %s5422_s30 = smov 0   ;;  %s5424_s10 = smov 0  }
   0xe   :  { %s5426_s11 = smov 0   ;;  %s5428_s12 = smov 0  }
   0xf LB: > { %s5357_s13 = smov [#allocation7]   ;;  %s5443_s15 = sadd.s32 4294967295, %s5355_s12   ;;  %s5355_s12 = sphi %s5428_s12, %s6196_s12   ;;  %s5351_s11 = sphi %s5426_s11, %s6195_s11   ;;  %s5347_s10 = sphi %s5424_s10, %s6194_s10   ;;  %s5343_s30 = sphi %s5422_s30, %s6193_s30  }
  0x10   : > { %s272_s14 = sshll.u32 %s5357_s13, 4  ;;  %p4050_p0 = scmp.ge.s32.totalorder %s5355_s12, 1  ;;  %s5448_s14 = int_to_ptr.vmem [resolvable:$true] %s272_s14 }
  0x11   : > { %p6154_p1 = scmp.eq.s32.totalorder %s5443_s15, 0  ;;  %p260_p2 = scmp.lt.s32.totalorder %s5355_s12, 3 }
  0x12   : > { %s5358_s17 = smov [#allocation8]   ;;  %s5359_s20 = smov [#allocation10]  }
  0x13   : > { %p5450_p3 = pnand %p4050_p0, %p260_p2  ;;  %s285_s18 = sshll.u32 %s5358_s17, 4  ;;  %s5463_s18 = int_to_ptr.vmem [resolvable:$true] %s285_s18 }
  0x14   : > { %s298_s21 = sshll.u32 %s5359_s20, 4  ;;  %s6166_s2 = sld [smem:[#allocation21_spill]]  ;;  %s5465_s21 = int_to_ptr.vmem [resolvable:$true] %s298_s21 }
  0x15   : > { %s6164_s16 = scalar_select %p5450_p3, 1, 0 }
  0x16   : > { %p4969_p5 = pneg %p5450_p3 }
  0x18   : > { %p5459_p6 = pnand %p4969_p5, %p6154_p1 }
  0x1a   : > { %s5101_s24 = scalar_lea.hbm %s6166_s2, 2048  ;;  %p5475_p8 = pneg %p5459_p6 }
  0x1b   : > { %p5102_p7 = scmp.ne.s32.totalorder %s6166_s2, %s5101_s24  ;;  %p5108_p11 = scmp.lt.u32.totalorder %s5101_s24, %s6166_s2 }
  0x1d   : > { %p5104_p9 = pnand %p5475_p8, %p5102_p7 }
  0x1f   : > { %p5105_p10 = pneg %p5104_p9 }
  0x21   : > { %p5110_p12 = pnand %p5108_p11, %p5105_p10 }
  0x23   : > { %5113 = shalt.err (!%p5110_p12)
}
  0x24   : > { %s5114_s13 = scalar_lea.vmem %s5448_s14, 2048  ;;  %p5122_p5 = scmp.lt.s32.totalorder %s5448_s14, %s5448_s14 }
  0x25   : > { %p5115_p13 = scmp.ne.s32.totalorder %s5448_s14, %s5114_s13  ;;  %p5123_p4 = scmp.lt.s32.totalorder %s5114_s13, %s5114_s13 }
  0x27   : > { %p5117_p0 = pnand %p5115_p13, %p5475_p8  ;;  %p5124_p7 = por %p5123_p4, %p5122_p5 }
  0x29   : > { %p5118_p2 = pneg %p5117_p0 }
  0x2b   : > { %p5125_p9 = pnand %p5124_p7, %p5118_p2 }
  0x2d   : > { %5128 = shalt.err (!%p5125_p9)
}
  0x2e   : > { %s6156_s17 = smov 128   ;;  %s6157_s20 = smov 8  }
  0x2f   : > { %4972 = dma.hbm_to_vmem [thread:$0]  (!%p5459_p6), %s6166_s2, 2048, %s5448_s14, [#allocation6], %s6156_s17, %s6156_s17, %s6157_s20  }
  0x30   : > { %s6168_s3 = sld [smem:[#allocation22_spill]] }
  0x36   : > { %s5129_s26 = scalar_lea.hbm %s6168_s3, 2048 }
  0x37   : > { %p5130_p4 = scmp.ne.s32.totalorder %s6168_s3, %s5129_s26  ;;  %p5136_p12 = scmp.lt.u32.totalorder %s5129_s26, %s6168_s3 }
  0x39   : > { %p5132_p10 = pnand %p5130_p4, %p5475_p8 }
  0x3b   : > { %p5133_p11 = pneg %p5132_p10 }
  0x3d   : > { %p5138_p13 = pnand %p5136_p12, %p5133_p11 }
  0x3f   : > { %5141 = shalt.err (!%p5138_p13)
}
  0x40   : > { %s5142_s14 = scalar_lea.vmem %s5463_s18, 2048  ;;  %p5150_p7 = scmp.lt.s32.totalorder %s5463_s18, %s5463_s18 }
  0x41   : > { %p5143_p0 = scmp.ne.s32.totalorder %s5463_s18, %s5142_s14  ;;  %p5151_p9 = scmp.lt.s32.totalorder %s5142_s14, %s5142_s14 }
  0x43   : > { %p5145_p2 = pnand %p5143_p0, %p5475_p8  ;;  %p5152_p4 = por %p5151_p9, %p5150_p7 }
  0x45   : > { %p5146_p5 = pneg %p5145_p2 }
  0x47   : > { %p5153_p10 = pnand %p5152_p4, %p5146_p5 }
  0x49   : > { %5156 = shalt.err (!%p5153_p10)
}
  0x4a   : > { %4975 = dma.hbm_to_vmem [thread:$0]  (!%p5459_p6), %s6168_s3, 2048, %s5463_s18, [#allocation9], %s6156_s17, %s6156_s17, %s6157_s20  }
  0x4b   : > { %s6169_s4 = sld [smem:[#allocation23_spill]] }
  0x51   : > { %s5157_s25 = scalar_lea.hbm %s6169_s4, 2048 }
  0x52   : > { %p5158_p11 = scmp.ne.s32.totalorder %s6169_s4, %s5157_s25  ;;  %p5164_p0 = scmp.lt.u32.totalorder %s5157_s25, %s6169_s4 }
  0x54   : > { %p5160_p12 = pnand %p5158_p11, %p5475_p8 }
  0x56   : > { %p5161_p13 = pneg %p5160_p12 }
  0x58   : > { %p5166_p2 = pnand %p5164_p0, %p5161_p13 }
  0x5a   : > { %5169 = shalt.err (!%p5166_p2)
}
  0x5b   : > { %s5170_s18 = scalar_lea.vmem %s5465_s21, 2048  ;;  %p5178_p4 = scmp.lt.s32.totalorder %s5465_s21, %s5465_s21 }
  0x5c   : > { %p5171_p5 = scmp.ne.s32.totalorder %s5465_s21, %s5170_s18  ;;  %p5179_p10 = scmp.lt.s32.totalorder %s5170_s18, %s5170_s18 }
  0x5e   : > { %p5173_p7 = pnand %p5171_p5, %p5475_p8  ;;  %p5180_p11 = por %p5179_p10, %p5178_p4 }
  0x60   : > { %p5174_p9 = pneg %p5173_p7 }
  0x62   : > { %p5181_p12 = pnand %p5180_p11, %p5174_p9 }
  0x64   : > { %5184 = shalt.err (!%p5181_p12)
}
  0x65   : > { %4978 = dma.hbm_to_vmem [thread:$0]  (!%p5459_p6), %s6169_s4, 2048, %s5465_s21, [#allocation9], %s6156_s17, %s6156_s17, %s6157_s20  }
  0x66   : > { %s5362_s22 = smov [#allocation11]   ;;  %s5185_s26 = scalar_lea.hbm %s6148_s5, 2048 }
  0x67   : > { %s311_s23 = sshll.u32 %s5362_s22, 4  ;;  %p5186_p13 = scmp.ne.s32.totalorder %s6148_s5, %s5185_s26  ;;  %s312_s23 = int_to_ptr.vmem [resolvable:$true] %s311_s23 }
  0x68   : > { %p5192_p5 = scmp.lt.u32.totalorder %s5185_s26, %s6148_s5 }
  0x69   : > { %p5188_p0 = pnand %p5186_p13, %p5475_p8 }
  0x6b   : > { %p5189_p2 = pneg %p5188_p0 }
  0x6d   : > { %p5194_p7 = pnand %p5192_p5, %p5189_p2 }
  0x6f   : > { %5197 = shalt.err (!%p5194_p7)
}
  0x70   : > { %s5198_s21 = scalar_lea.vmem %s312_s23, 2048  ;;  %p5206_p11 = scmp.lt.s32.totalorder %s312_s23, %s312_s23 }
  0x71   : > { %p5199_p9 = scmp.ne.s32.totalorder %s312_s23, %s5198_s21  ;;  %p5207_p12 = scmp.lt.s32.totalorder %s5198_s21, %s5198_s21 }
  0x73   : > { %p5201_p4 = pnand %p5199_p9, %p5475_p8  ;;  %p5208_p1 = por %p5207_p12, %p5206_p11 }
  0x75   : > { %p5202_p10 = pneg %p5201_p4 }
  0x77   : > { %p5209_p3 = pnand %p5208_p1, %p5202_p10 }
  0x79   : > { %5212 = shalt.err (!%p5209_p3)
}
  0x7a   : > { %4981 = dma.hbm_to_vmem [thread:$0]  (!%p5459_p6), %s6148_s5, 2048, %s312_s23, [#allocation12], %s6156_s17, %s6156_s17, %s6157_s20  }
  0x7b   : > { %s4049_s19 = sadd.s32 4294967294, %s5355_s12   ;;  %s5574_s27 = sadd.s32 1, %s5355_s12  }
  0x7c   : > { %s34_s22 = ssub.s32 %s5355_s12, %s5574_s27  ;;  %s37_s24 = sadd.s32 1, %s5351_s11 }
  0x7d   : > { %p35_p1 = scmp.eq.s32.totalorder %s34_s22, 0  ;;  %p44_p3 = scmp.ne.s32.totalorder %s5351_s11, %s5347_s10 }
  0x7e   : > { %p45_p8 = scmp.eq.s32.totalorder %s5355_s12, 0  ;;  %p50_p13 = scmp.ne.s32.totalorder %s5347_s10, %s5343_s30 }
  0x7f   : > { %s5585_s25 = scalar_select %p35_p1, %s5351_s11, %s37_s24  }
  0x80   : > { %p5587_p0 = por %p45_p8, %p44_p3  ;;  %p6171_p2 = scmp.eq.s32.totalorder %s5443_s15, 0 }
  0x81   : > { %p247_p5 = scmp.eq.s32.totalorder %s5443_s15, 1  ;;  %p253_p7 = scmp.eq.s32.totalorder %s4049_s19, 1 }
  0x82   : > { %p5593_p6 = por %p6171_p2, %p50_p13  ;;  %p4997_p9 = scmp.lt.s32.totalorder %s5355_s12, 2 }
  0x83   : > { %s5600_s28 = sand.u32 1, %s5351_s11   ;;  %p5602_p4 = por %p247_p5, %p44_p3 }
  0x84   : > { %p5606_p10 = por %p253_p7, %p50_p13  ;;  %s4056_s18 = sshll.u32 %s5600_s28, 3 }
  0x85   : > { %s6173_s29 = scalar_select %p5602_p4, 1, 0 }
  0x86   : > { %s6174_s13 = scalar_select %p5606_p10, 1, 0 }
  0x87   : > { %s4057_s21 = sshll.u32 %s5355_s12, 7  ;;  %s6175_s0 = sld [smem:[#allocation20_spill]] }
  0x88   : > { %s338_s22 = scalar_lea.vmem [#allocation2], %s4056_s18  ;;  %p5621_p11 = pnand %p4997_p9, %p5587_p0 }
  0x89   : > { %s345_s24 = sshll.u32 %s338_s22, 4  ;;  %s4058_s20 = sshll.u32 %s5600_s28, 4  ;;  %s5617_s24 = int_to_ptr.vmem [resolvable:$true] %s345_s24 }
  0x8a   : > { %s335_s14 = scalar_lea.sflag [#allocation3], %s5600_s28  ;;  %p5215_p1 = pneg %p5621_p11 }
  0x8d   : > { %s5615_s19 = scalar_lea.hbm %s6175_s0, %s4057_s21  ;;  %s5218_s26 = scalar_lea.hbm %s6175_s0, 256 }
  0x8e   : > { %s5213_s21 = scalar_lea.hbm %s5615_s19, 128  ;;  %p5219_p13 = scmp.lt.u32.totalorder %s5615_s19, %s6175_s0 }
  0x8f   : > { %p5214_p12 = scmp.ne.s32.totalorder %s5615_s19, %s5213_s21  ;;  %p5220_p0 = scmp.lt.u32.totalorder %s5218_s26, %s5213_s21 }
  0x90   : > { %p5222_p5 = scmp.lt.u32.totalorder %s5213_s21, %s5615_s19 }
  0x91   : > { %p5216_p3 = pnand %p5215_p1, %p5214_p12  ;;  %p5221_p2 = por %p5220_p0, %p5219_p13 }
  0x93   : > { %p5217_p8 = pneg %p5216_p3  ;;  %p5223_p7 = por %p5222_p5, %p5221_p2 }
  0x95   : > { %p5224_p9 = pnand %p5223_p7, %p5217_p8 }
  0x97   : > { %5227 = shalt.err (!%p5224_p9)
}
  0x98   : > { %s5228_s2 = scalar_lea.vmem %s5617_s24, 128  ;;  %s5363_s18 = smov [#allocation2]  }
  0x99   : > { %p5229_p12 = scmp.ne.s32.totalorder %s5617_s24, %s5228_s2  ;;  %s5233_s9 = sshll.u32 %s5363_s18, 4  ;;  %s5234_s9 = int_to_ptr.vmem [resolvable:$false] %s5233_s9 }
  0x9a   : > { %s5235_s3 = scalar_lea.vmem %s5234_s9, 256  ;;  %p5236_p4 = scmp.lt.s32.totalorder %s5617_s24, %s5234_s9 }
  0x9b   : > { %p5231_p3 = pnand %p5229_p12, %p5215_p1  ;;  %p5237_p13 = scmp.lt.s32.totalorder %s5235_s3, %s5228_s2 }
  0x9d   : > { %p5232_p10 = pneg %p5231_p3  ;;  %p5238_p0 = por %p5237_p13, %p5236_p4 }
  0x9f   : > { %p5239_p2 = pnand %p5238_p0, %p5232_p10 }
  0xa1   : > { %5242 = shalt.err (!%p5239_p2)
}
  0xa2   : > { %4985 = dma.hbm_to_vmem [thread:$0]  (!%p5621_p11), %s5615_s19, 128, %s5617_s24, %s335_s14  }
  0xa3   : > { %s356_s21 = scalar_lea.vmem [#allocation5], %s4058_s20  ;;  %s4128_s22 = sshll.u32 %s5355_s12, 8 }
  0xa4   : > { %s363_s26 = sshll.u32 %s356_s21, 4  ;;  %s5661_s9 = scalar_lea.hbm %s6144_s1, %s4128_s22  ;;  %s5655_s26 = int_to_ptr.vmem [resolvable:$true] %s363_s26 }
  0xa5   : > { %s6177_s3 = sand.u32 1, %s5355_s12   ;;  %s5243_s4 = scalar_lea.hbm %s5661_s9, 256 }
  0xa6   : > { %s5665_s0 = scalar_lea.sflag [#allocation6], %s6177_s3  ;;  %p5244_p4 = scmp.ne.s32.totalorder %s5661_s9, %s5243_s4 }
  0xa7   : > { %s5248_s19 = scalar_lea.hbm %s6144_s1, 512  ;;  %p5249_p5 = scmp.lt.u32.totalorder %s5661_s9, %s6144_s1 }
  0xa8   : > { %p5246_p10 = pnand %p5244_p4, %p5215_p1  ;;  %p5250_p7 = scmp.lt.u32.totalorder %s5248_s19, %s5243_s4 }
  0xa9   : > { %p5252_p12 = scmp.lt.u32.totalorder %s5243_s4, %s5661_s9 }
  0xaa   : > { %p5247_p8 = pneg %p5246_p10  ;;  %p5251_p9 = por %p5250_p7, %p5249_p5 }
  0xac   : > { %p5253_p3 = por %p5252_p12, %p5251_p9 }
  0xae   : > { %p5254_p13 = pnand %p5253_p3, %p5247_p8 }
  0xb0   : > { %5257 = shalt.err (!%p5254_p13)
}
  0xb1   : > { %s5258_s21 = scalar_lea.vmem %s5655_s26, 256  ;;  %s5364_s22 = smov [#allocation5]  }
  0xb2   : > { %p5259_p0 = scmp.ne.s32.totalorder %s5655_s26, %s5258_s21  ;;  %s5263_s18 = sshll.u32 %s5364_s22, 4  ;;  %s5264_s18 = int_to_ptr.vmem [resolvable:$false] %s5263_s18 }
  0xb3   : > { %s5265_s2 = scalar_lea.vmem %s5264_s18, 512  ;;  %p5266_p10 = scmp.lt.s32.totalorder %s5655_s26, %s5264_s18 }
  0xb4   : > { %p5261_p2 = pnand %p5259_p0, %p5215_p1  ;;  %p5267_p5 = scmp.lt.s32.totalorder %s5265_s2, %s5258_s21 }
  0xb6   : > { %p5262_p4 = pneg %p5261_p2  ;;  %p5268_p7 = por %p5267_p5, %p5266_p10 }
  0xb8   : > { %p5269_p9 = pnand %p5268_p7, %p5262_p4 }
  0xba   : > { %5272 = shalt.err (!%p5269_p9)
}
  0xbb   : > { %s6178_s4 = smov 8   ;;  %s6179_s3 = smov 128  }
  0xbc   : > { %4988 = dma.hbm_to_vmem [thread:$0]  (!%p5621_p11), %s5661_s9, 256, %s5655_s26, %s5665_s0, %s6179_s3, %s6179_s3, %s6178_s4  }
  0xbd   : > { %p6180_p1 = scmp.ne.s32.totalorder %s6164_s16, 0 }
  0xbe   : > { %s5697_s20 = sand.u32 (!%p6180_p1), 1, %s5347_s10  }
  0xbf   : > { %375 = sbr.rel (%p6180_p1) target bundleno = 5733 (0x1665), region = 56  ;;  %s4062_s28 = sshll.u32 (!%p6180_p1), %s5697_s20, 3 }
  0xc0   : > { %s378_s19 = scalar_lea.sflag (!%p6180_p1), [#allocation3], %s5697_s20  ;;  %s5703_s17 = scalar_lea.vmem (!%p6180_p1), [#allocation2], %s4062_s28 }
  0xc6   : > { %5318 = dma.done.wait (%p5593_p6), %s378_s19, 128  }
  0xc7   : > { %5320 = vsyncadd (%p5593_p6), %s378_s19, 4294967168  ;;  %s386_s0 = sand.u32 1, %s5443_s15   ;;  %s4063_s16 = sshll.u32 %s5697_s20, 4 }
  0xc8   : > { %s387_s26 = scalar_lea.sflag [#allocation6], %s386_s0  ;;  %s5711_s9 = scalar_lea.vmem [#allocation5], %s4063_s16 }
  0xc9   : > { %5322 = dma.done.wait (%p5593_p6), %s387_s26, 256  }
  0xca   : > { %5324 = vsyncadd (%p5593_p6), %s387_s26, 4294967040  ;;  %p6181_p11 = scmp.eq.s32.totalorder %s5443_s15, 0 }
  0xcc   : > { %5326 = dma.done.wait (%p6181_p11), [#allocation6], 2048   ;;  %p6182_p8 = pmov %p6181_p11 }
  0xce   : > { %5328 = vsyncadd (%p6182_p8), [#allocation6], 4294965248  ;;  %p6183_p12 = pmov %p6182_p8 }
  0xcf   : > { %p6184_p3 = pmov %p6182_p8 }
  0xd0   : > { %5330 = dma.done.wait (%p6183_p12), [#allocation9], 4096  }
  0xd1   : > { %5332 = vsyncadd (%p6184_p3), [#allocation9], 4294963200  ;;  %p6185_p13 = pmov %p6184_p3 }
  0xd2   : > { %p6186_p0 = pmov %p6184_p3 }
  0xd3   : > { %5334 = dma.done.wait (%p6185_p13), [#allocation12], 2048  }
  0xd4   : > { %5336 = vsyncadd (%p6186_p0), [#allocation12], 4294965248  ;;  %v5365_v0 = vmov 0.0|0.0   ;;  %vm5366_vm0 = vmmov 0   ;;  %v5367_v1 = vmov 0.0   ;;  %v535_v2 = vld [vmem:[#allocation8] sm:$0xff] }
  0xd5   : > { %4735 = vmatprep.subr.bf16.mxu0 %v5365_v0  ;;  %4350 = vmatprep.mubr.msk.f32.mxu0 %vm5366_vm0, %v5367_v1  ;;  %v536_v3 = vld [vmem:[#allocation8 + $0x8] sm:$0xff]  ;;  %v537_v4 = vld [vmem:[#allocation8 + $0x10] sm:$0xff]  ;;  %v538_v6 = vld [vmem:[#allocation8 + $0x18] sm:$0xff]  ;;  %vm740_vm1 = vcmask 261120   ;;  %s5368_s23 = smov 96   ;;  %vm821_vm3 = vcmask 130048  }
  0xd6   : > { %v4759_v5 = vpack.c.bf16 %v536_v3, %v535_v2  ;;  %v539_v7 = vld [vmem:[#allocation8 + $0x20] sm:$0xff]  ;;  %v4763_v8 = vpack.c.bf16 %v538_v6, %v537_v4  ;;  %v540_v9 = vld [vmem:[#allocation8 + $0x28] sm:$0xff]  ;;  %v451_v13 = vld [vmem:[#allocation7 + $0x10] sm:$0xff]  ;;  %vm906_vm5 = vcmask 64512   ;;  %s5369_s24 = smov 64   ;;  %s5370_s14 = smov 32  }
  0xd7   : > { %v449_v10 = vld [vmem:[#allocation7] sm:$0xff]  ;;  %v450_v11 = vld [vmem:[#allocation7 + $0x8] sm:$0xff]  ;;  %v452_v14 = vld [vmem:[#allocation7 + $0x18] sm:$0xff]  ;;  %v4767_v15 = vpack.c.bf16 %v540_v9, %v539_v7  ;;  %vm1517_vm9 = vcmask 1041408   ;;  %vm2317_vm10 = vcmask 1043458   ;;  %vm3102_vm11 = vcmask 1045508  }
  0xd8   : > { %4760 = vmatprep.subr.bf16.mxu1 %v4759_v5  ;;  %v4736_v12 = vpack.c.bf16 %v450_v11, %v449_v10  ;;  %v541_v16 = vld [vmem:[#allocation8 + $0x30] sm:$0xff]  ;;  %v4739_v17 = vpack.c.bf16 %v452_v14, %v451_v13  ;;  %v542_v18 = vld [vmem:[#allocation8 + $0x38] sm:$0xff]  ;;  %v453_v19 = vld [vmem:[#allocation7 + $0x20] sm:$0xff]  ;;  %vm3887_vm12 = vcmask 1047558   ;;  %s445_s19 = scalar_lea.vmem [#allocation13], %s4062_s28  ;;  %s6189_s26 = sld [smem:[#allocation24_spill]] }
  0xd9   : > { %4762 = vmatpush3.bf16.msra.mxu1 %v4759_v5  ;;  %v454_v20 = vld [vmem:[#allocation7 + $0x28] sm:$0xff]  ;;  %v4771_v21 = vpack.c.bf16 %v542_v18, %v541_v16  ;;  %v543_v22 = vld [vmem:[#allocation8 + $0x40] sm:$0xff]  ;;  %v455_v26 = vld [vmem:[#allocation7 + $0x30] sm:$0xff]  ;;  %s3918_s0 = sshll.u32 %s445_s19, 4  ;;  %p6190_p2 = scmp.ne.s32.totalorder %s6173_s29, 0  ;;  %s6101_s0 = int_to_ptr.vmem [resolvable:$true] %s3918_s0 }
  0xda   : > { %4764 = vmatprep.subr.bf16.mxu1 %v4763_v8  ;;  %4737 = vmatpush3.bf16.msra.mxu0 %v4736_v12  ;;  %v4742_v23 = vpack.c.bf16 %v454_v20, %v453_v19  ;;  %v447_v24 = vld [vmem:[%s5711_s9] sm:$0xff]  ;;  %v544_v25 = vld [vmem:[#allocation8 + $0x48] sm:$0xff]  ;;  %v456_v27 = vld [vmem:[#allocation7 + $0x38] sm:$0xff] }
  0xdb   : > { %4738 = vmatprep.subr.bf16.mxu0 %v5365_v0  ;;  %4385 = vmatprep.mubr.f32.mxu1 %v447_v24  ;;  %v4775_v28 = vpack.c.bf16 %v544_v25, %v543_v22  ;;  %v545_v29 = vld [vmem:[#allocation8 + $0x50] sm:$0xff]  ;;  %v4745_v30 = vpack.c.bf16 %v456_v27, %v455_v26  ;;  %v546_v31 = vld [vmem:[#allocation8 + $0x58] sm:$0xff]  ;;  %v457_v32 = vld [vmem:[#allocation7 + $0x40] sm:$0xff] }
  0xdc   : > { %v458_v33 = vld [vmem:[#allocation7 + $0x48] sm:$0xff]  ;;  %v4779_v34 = vpack.c.bf16 %v546_v31, %v545_v29  ;;  %v547_v35 = vld [vmem:[#allocation8 + $0x60] sm:$0xff]  ;;  %v459_v38 = vld [vmem:[#allocation7 + $0x50] sm:$0xff] }
  0xdd   : > { %4766 = vmatpush3.bf16.msra.mxu1 %v4763_v8  ;;  %v4748_v36 = vpack.c.bf16 %v458_v33, %v457_v32  ;;  %v548_v37 = vld [vmem:[#allocation8 + $0x68] sm:$0xff]  ;;  %v460_v39 = vld [vmem:[#allocation7 + $0x58] sm:$0xff]  ;;  %v549_v41 = vld [vmem:[#allocation8 + $0x70] sm:$0xff] }
  0xde   : > { %4768 = vmatprep.subr.bf16.mxu1 %v4767_v15  ;;  %4740 = vmatpush3.bf16.msra.mxu0 %v4739_v17  ;;  %v4783_v40 = vpack.c.bf16 %v548_v37, %v547_v35  ;;  %v4751_v42 = vpack.c.bf16 %v460_v39, %v459_v38  ;;  %v550_v43 = vld [vmem:[#allocation8 + $0x78] sm:$0xff]  ;;  %v461_v44 = vld [vmem:[#allocation7 + $0x60] sm:$0xff]  ;;  %v462_v45 = vld [vmem:[#allocation7 + $0x68] sm:$0xff]  ;;  %v717_v38 = vlaneseq }
  0xdf   : > { %4741 = vmatprep.subr.bf16.mxu0 %v5365_v0  ;;  %v4787_v46 = vpack.c.bf16 %v550_v43, %v549_v41  ;;  %v4754_v47 = vpack.c.bf16 %v462_v45, %v461_v44  ;;  %v463_v48 = vld [vmem:[#allocation7 + $0x70] sm:$0xff]  ;;  %v464_v49 = vld [vmem:[#allocation7 + $0x78] sm:$0xff]  ;;  %vm5753_vm2 = vmpackc.low %vm740_vm1, %vm740_vm1 }
  0xe0   : > { %v4757_v50 = vpack.c.bf16 %v464_v49, %v463_v48  ;;  %v5741_v51 = vld [vmem:[%s5711_s9 + $0x8] sm:$0xff]  ;;  %v626_v60 = vld [vmem:[#allocation10] sm:$0xff]  ;;  %v628_v62 = vld [vmem:[#allocation10 + $0x10] sm:$0xff]  ;;  %v718_v39 = vshrl.u32 %v717_v38, 7 }
  0xe1   : > { %4770 = vmatpush3.bf16.msra.mxu1 %v4767_v15  ;;  %v5744_v52 = vld [vmem:[%s5703_s17] sm:$0xff]  ;;  %v627_v61 = vld [vmem:[#allocation10 + $0x8] sm:$0xff]  ;;  %v630_v4 = vld [vmem:[#allocation10 + $0x20] sm:$0xff]  ;;  %s4125_s17 = sshll.u32 %s5443_s15, 7  ;;  %s5371_s15 = smov [#allocation13]  }
  0xe2   : > { %4772 = vmatprep.subr.bf16.mxu1 %v4771_v21  ;;  %4743 = vmatpush3.bf16.msra.mxu0 %v4742_v23  ;;  %v4791_v63 = vpack.c.bf16 %v627_v61, %v626_v60  ;;  %v629_v2 = vld [vmem:[#allocation10 + $0x18] sm:$0xff]  ;;  %v631_v5 = vld [vmem:[#allocation10 + $0x28] sm:$0xff]  ;;  %v632_v7 = vld [vmem:[#allocation10 + $0x30] sm:$0xff]  ;;  %v721_v41 = vmul.u32 4, %v718_v39  ;;  %s6099_s9 = scalar_lea.hbm %s6189_s26, %s4125_s17 }
  0xe3   : > { %4744 = vmatprep.subr.bf16.mxu0 %v5365_v0  ;;  %v4795_v3 = vpack.c.bf16 %v629_v2, %v628_v62  ;;  %v4799_v6 = vpack.c.bf16 %v631_v5, %v630_v4  ;;  %v633_v8 = vld [vmem:[#allocation10 + $0x38] sm:$0xff]  ;;  %v634_v10 = vld [vmem:[#allocation10 + $0x40] sm:$0xff]  ;;  %v635_v11 = vld [vmem:[#allocation10 + $0x48] sm:$0xff] }
  0xe4   : > { %v4803_v9 = vpack.c.bf16 %v633_v8, %v632_v7  ;;  %v4807_v12 = vpack.c.bf16 %v635_v11, %v634_v10  ;;  %v636_v13 = vld [vmem:[#allocation10 + $0x50] sm:$0xff]  ;;  %v637_v14 = vld [vmem:[#allocation10 + $0x58] sm:$0xff]  ;;  %v638_v16 = vld [vmem:[#allocation10 + $0x60] sm:$0xff]  ;;  %v729_v8 = vadd.s32 2, %v721_v41 }
  0xe5   : > { %4774 = vmatpush3.bf16.msra.mxu1 %v4771_v21  ;;  %v4811_v15 = vpack.c.bf16 %v637_v14, %v636_v13  ;;  %v639_v17 = vld [vmem:[#allocation10 + $0x68] sm:$0xff]  ;;  %v640_v19 = vld [vmem:[#allocation10 + $0x70] sm:$0xff]  ;;  %v641_v20 = vld [vmem:[#allocation10 + $0x78] sm:$0xff] }
  0xe6   : > { %4776 = vmatprep.subr.bf16.mxu1 %v4775_v28  ;;  %4746 = vmatpush3.bf16.msra.mxu0 %v4745_v30  ;;  %v4815_v18 = vpack.c.bf16 %v639_v17, %v638_v16  ;;  %v4819_v21 = vpack.c.bf16 %v641_v20, %v640_v19  ;;  %v1057_v45 = vld [vmem:[#allocation11 + $0x20] sm:$0xff]  ;;  %v981_v61 = vld [vmem:[#allocation11 + $0x8] sm:$0xff]  ;;  %v983_v4 = vld [vmem:[#allocation11 + $0x18] sm:$0xff] }
  0xe7   : > { %4747 = vmatprep.subr.bf16.mxu0 %v5365_v0  ;;  %v980_v60 = vld [vmem:[#allocation11] sm:$0xff]  ;;  %v1283_v13 = vld [vmem:[#allocation11 + $0x58] sm:$0xff]  ;;  %v1432_v16 = vld [vmem:[#allocation11 + $0x68] sm:$0xff] }
  0xe8   : > { %v5812_v2 = vpack.c.bf16 %v981_v61, %v980_v60  ;;  %v1434_v19 = vld [vmem:[#allocation11 + $0x78] sm:$0xff] }
  0xe9   : > { %4778 = vmatpush3.bf16.msra.mxu1 %v4775_v28 }
  0xea   : > { %4780 = vmatprep.subr.bf16.mxu1 %v4779_v34  ;;  %4749 = vmatpush3.bf16.msra.mxu0 %v4748_v36 }
  0xeb   : > { %4750 = vmatprep.subr.bf16.mxu0 %v5365_v0 }
  0xed   : > { %4782 = vmatpush3.bf16.msra.mxu1 %v4779_v34 }
  0xee   : > { %4784 = vmatprep.subr.bf16.mxu1 %v4783_v40  ;;  %4752 = vmatpush3.bf16.msra.mxu0 %v4751_v42  ;;  %v725_v42 = vadd.s32 1, %v721_v41 }
  0xef   : > { %4753 = vmatprep.subr.bf16.mxu0 %v5365_v0 }
  0xf1   : > { %4786 = vmatpush3.bf16.msra.mxu1 %v4783_v40  ;;  %v720_v40 = vand.u32 127, %v717_v38 }
  0xf2   : > { %4788 = vmatprep.subr.bf16.mxu1 %v4787_v46  ;;  %4755 = vmatpush3.bf16.msra.mxu0 %v4754_v47 }
  0xf3   : > { %4756 = vmatprep.subr.bf16.mxu0 %v5365_v0  ;;  %vm722_vm4 = vcmp.eq.s32.totalorder %v720_v40, %v721_v41  ;;  %vm726_vm6 = vcmp.eq.s32.totalorder %v720_v40, %v725_v42  ;;  %vm730_vm7 = vcmp.eq.s32.totalorder %v720_v40, %v729_v8 }
  0xf4   : > { %v5785_v43 = vsel %vm722_vm4, 1.0, %v5367_v1  ;;  %v5793_v48 = vsel %vm726_vm6, 1.0, %v5367_v1  ;;  %v5827_v10 = vsel %vm730_vm7, 1.0, %v5367_v1 }
  0xf5   : > { %4790 = vmatpush3.bf16.msra.mxu1 %v4787_v46  ;;  %v1058_v46 = vld [vmem:[#allocation11 + $0x28] sm:$0xff] }
  0xf6   : > { %4758 = vmatpush3.bf16.msra.mxu0 %v4757_v50  ;;  %4823 = vmatprep.subr.bf16.mxu1 %v5365_v0  ;;  %v5795_v49 = vpack.c.bf16 %v1058_v46, %v1057_v45  ;;  %v1059_v50 = vld [vmem:[#allocation11 + $0x30] sm:$0xff] }
  0xf7   : > { %4792 = vmatprep.subr.bf16.mxu0 %v4791_v63 }
  0xf8   : > { %4386 = vmatmul.mubr.f32.vlgmr.msra.gmra.mrb[0].mxu1 %v5741_v51 }
  0xf9   : > { %4351 = vmatmul.mubr.f32.vlgmr.msra.gmra.mrb[0].mxu0 %v5744_v52  ;;  %4427 = vmatprep.mubr.msk.f32.mxu1 %vm5366_vm0, %v5367_v1 }
  0xfa   : > { %4420 = vmatprep.mubr.f32.mxu0 %v447_v24  ;;  %4794 = vmatpush3.bf16.msra.mxu0 %v4791_v63 }
  0xfb   : > { %4796 = vmatprep.subr.bf16.mxu0 %v4795_v3 }
  0xfe   : > { %4798 = vmatpush3.bf16.msra.mxu0 %v4795_v3  ;;  %v982_v3 = vld [vmem:[#allocation11 + $0x10] sm:$0xff] }
  0xff   : > { %4800 = vmatprep.subr.bf16.mxu0 %v4799_v6  ;;  %v5816_v7 = vpack.c.bf16 %v983_v4, %v982_v3 }
 0x102   : > { %4802 = vmatpush3.bf16.msra.mxu0 %v4799_v6 }
 0x103   : > { %4804 = vmatprep.subr.bf16.mxu0 %v4803_v9 }
 0x106   : > { %4806 = vmatpush3.bf16.msra.mxu0 %v4803_v9  ;;  %v733_v9 = vadd.s32 3, %v721_v41 }
 0x107   : > { %4808 = vmatprep.subr.bf16.mxu0 %v4807_v12 }
 0x108   : > { %vm734_vm8 = vcmp.eq.s32.totalorder %v720_v40, %v733_v9 }
 0x109   : > { %v5835_v11 = vsel %vm734_vm8, 1.0, %v5367_v1 }
 0x10a   : > { %4810 = vmatpush3.bf16.msra.mxu0 %v4807_v12  ;;  %v1282_v12 = vld [vmem:[#allocation11 + $0x50] sm:$0xff] }
 0x10b   : > { %4812 = vmatprep.subr.bf16.mxu0 %v4811_v15  ;;  %v5842_v14 = vpack.c.bf16 %v1283_v13, %v1282_v12 }
 0x10e   : > { %4814 = vmatpush3.bf16.msra.mxu0 %v4811_v15  ;;  %v1431_v15 = vld [vmem:[#allocation11 + $0x60] sm:$0xff] }
 0x10f   : > { %4816 = vmatprep.subr.bf16.mxu0 %v4815_v18  ;;  %v5846_v17 = vpack.c.bf16 %v1432_v16, %v1431_v15 }
 0x112   : > { %4818 = vmatpush3.bf16.msra.mxu0 %v4815_v18  ;;  %v1433_v18 = vld [vmem:[#allocation11 + $0x70] sm:$0xff] }
 0x113   : > { %4820 = vmatprep.subr.bf16.mxu0 %v4819_v21  ;;  %v5850_v20 = vpack.c.bf16 %v1434_v19, %v1433_v18 }
 0x116   : > { %4822 = vmatpush3.bf16.msra.mxu0 %v4819_v21 }
 0x117   : > { %4842 = vmatprep.subr.bf16.mxu0 %v5365_v0 }
 0x119   : > { %4421 = vmatmul.mubr.f32.vlgmr.msra.gmra.mrb[2].mxu0 %v5741_v51  ;;  %v1060_v51 = vld [vmem:[#allocation11 + $0x38] sm:$0xff] }
 0x11a   : > { %4482 = vmatprep.mubr.msk.f32.mxu0 %vm5366_vm0, %v5367_v1 }
 0x1cb   : > { %v4387_v53 = vpop.f32.mrb[0].mxu1 }
 0x1cc   : > { %v617_v54 = vpop.f32.mrb[1].mxu1  ;;  %v5757_v56 = vpop.f32.mrb[0].mxu0 }
 0x1cd   : > { %v4824_v57 = vpack.c.bf16 %v4387_v53, %v617_v54  ;;  %v5759_v58 = vpack.i.bf16 %v4387_v53, %v617_v54  ;;  %v4352_v59 = vpop.f32.mrb[1].mxu0  ;;  %v5804_v53 = vpack.c.bf16 %v1060_v51, %v1059_v50  ;;  %v1280_v54 = vld [vmem:[#allocation11 + $0x40] sm:$0xff] }
 0x1cf   : > { %5048 = vrot.lane.b32.xlu1 %v5759_v58, %s5368_s23  ;;  %4826 = vmatpush3.bf16.xpose.msk.msra.mxu1 %vm5753_vm2, %v4824_v57  ;;  %v1281_v57 = vld [vmem:[#allocation11 + $0x48] sm:$0xff] }
 0x1d0   : > { %4827 = vmatprep.subr.bf16.mxu1 %v5365_v0  ;;  %v5808_v59 = vpack.c.bf16 %v1281_v57, %v1280_v54 }
 0x1d2   : > { %4844 = vmatpush3.bf16.msra.mxu0 %v5808_v59 }
 0x1d3   : > { %1547 = vrot.lane.b32.xlu1 %v5757_v56, %s5368_s23  ;;  %4845 = vmatprep.subr.bf16.mxu0 %v5365_v0 }
 0x1d6   : > { %4428 = vmatmul.mubr.msk.f32.vlgmr.msra.gmra.mrb[2].mxu1 %vm740_vm1, %v5757_v56  ;;  %4847 = vmatpush3.bf16.msra.mxu0 %v5842_v14 }
 0x1d7   : > { %4434 = vmatprep.mubr.msk.f32.mxu1 %vm5366_vm0, %v5367_v1  ;;  %4854 = vmatprep.subr.bf16.mxu0 %v5365_v0 }
 0x1ec   : > { %v4422_v31 = vpop.f32.mrb[2].mxu0 }
 0x1ed   : > { %v708_v32 = vpop.f32.mrb[3].mxu0 }
 0x1ee   : > { %v4828_v33 = vpack.c.bf16 %v4422_v31, %v708_v32  ;;  %v5778_v34 = vpack.i.bf16 %v4422_v31, %v708_v32 }
 0x1f0   : > { %4829 = vmatpush3.bf16.msra.mxu1 %v4828_v33 }
 0x1f1   : > { %4437 = vmatprep.subr.mxu1 %v5367_v1 }
 0x2a9   : > { %v816_v22 = vpop.f32.mrb[2].mxu1 }
 0x2aa   : > { %v820_v23 = vmul.f32 0.17677669, %v816_v22  ;;  %v4429_v24 = vpop.f32.mrb[3].mxu1 }
 0x2ac   : > { %v822_v25 = vsel %vm821_vm3, %v820_v23, -inf }
 0x2ad   : > { %823 = vmax.xlane.f32.xlu0 %v822_v25 }
 0x33a   : > { %v824_v26 = vpop.xlane.xlu0 %823 }
 0x33b   : > { %v825_v27 = vsub.f32 %v820_v23, %v824_v26  ;;  %v5049_v23 = vpop.permute.xlu1 %5048 }
 0x33c   : > { %v5051_v24 = vunpack.i.h.bf16 %v5049_v23  ;;  %v5050_v25 = vunpack.i.l.bf16 %v5049_v23 }
 0x33d   : > { %v826_v28 = vmul.f32 1.442695, %v825_v27 }
 0x33f   : > { %5077 = vpow2.f32 %v826_v28 }
 0x349   : > { %v5078_v29 = vpop.eup %5077 }
 0x34a   : > { %v828_v30 = vsel %vm821_vm3, %v5078_v29, 0.0 }
 0x34b   : > { %829 = vadd.xlane.f32.xlu0 %v828_v30 }
 0x3d8   : > { %v830_v35 = vpop.xlane.xlu0 %829 }
 0x3d9   : > { %5079 = vrcp.f32 %v830_v35  ;;  %v1548_v35 = vpop.permute.xlu1 %1547 }
 0x3e3   : > { %v5080_v36 = vpop.eup %5079 }
 0x3e4   : > { %v832_v37 = vmul.f32 %v5080_v36, %v5078_v29  ;;  %v4855_v29 = vpack.c.bf16 %v5051_v24, %v5050_v25 }
 0x3e6   : > { %4435 = vmatmul.mubr.msk.f32.vlgmr.msra.gmra.mrb[4].mxu1 %vm821_vm3, %v832_v37 }
 0x3e7   : > { %4439 = vmatprep.mubr.msk.f32.mxu1 %vm5366_vm0, %v5367_v1 }
 0x4b9   : > { %v902_v44 = vpop.f32.mrb[4].mxu1 }
 0x4ba   : > { %v4436_v47 = vpop.f32.mrb[5].mxu1  ;;  %4438 = vmatpush3.msra.mxu1 %v902_v44 }
 0x4bb   : > { %4440 = vmatmul.mubr.msk.f32.vlgmr.msra.gmra.mrb[6].mxu1 %vm906_vm5, %v5785_v43  ;;  %4442 = vmatprep.subr.mxu1 %v5367_v1 }
 0x4bc   : > { %4443 = vmatpush3.msra.mxu1 %v902_v44  ;;  %4444 = vmatprep.mubr.msk.f32.mxu1 %vm5366_vm0, %v5367_v1 }
 0x4bd   : > { %4830 = vmatprep.subr.bf16.mxu1 %v5365_v0 }
 0x4bf   : > { %4445 = vmatmul.mubr.msk.f32.vlgmr.msra.gmra.mrb[8].mxu1 %vm906_vm5, %v5793_v48 }
 0x4c0   : > { %4832 = vmatpush3.bf16.msra.mxu1 %v5795_v49  ;;  %4455 = vmatprep.mubr.msk.f32.mxu1 %vm5366_vm0, %v5367_v1 }
 0x4c1   : > { %4833 = vmatprep.subr.bf16.mxu1 %v5365_v0 }
 0x4c4   : > { %4835 = vmatpush3.bf16.msra.mxu1 %v5804_v53 }
 0x4c5   : > { %4836 = vmatprep.subr.bf16.mxu1 %v5365_v0 }
 0x58e   : > { %v976_v62 = vpop.f32.mrb[6].mxu1 }
 0x58f   : > { %v4441_v63 = vpop.f32.mrb[7].mxu1 }
 0x592   : > { %v1053_v5 = vpop.f32.mrb[8].mxu1 }
 0x593   : > { %v4446_v6 = vpop.f32.mrb[9].mxu1  ;;  %4456 = vmatmul.mubr.msk.f32.vlgmr.msra.gmra.mrb[10].mxu1 %vm740_vm1, %v1053_v5 }
 0x594   : > { %4838 = vmatpush3.bf16.msra.mxu1 %v5812_v2  ;;  %4466 = vmatprep.mubr.msk.f32.mxu1 %vm5366_vm0, %v5367_v1 }
 0x595   : > { %4839 = vmatprep.subr.bf16.mxu1 %v5365_v0 }
 0x598   : > { %4841 = vmatpush3.bf16.msra.mxu1 %v5816_v7 }
 0x599   : > { %4469 = vmatprep.subr.mxu1 %v5367_v1 }
 0x59b   : > { %4467 = vmatmul.mubr.msk.f32.vlgmr.msra.gmra.mrb[12].mxu1 %vm740_vm1, %v976_v62 }
 0x59c   : > { %4470 = vmatpush3.msra.mxu1 %v902_v44  ;;  %4471 = vmatprep.mubr.msk.f32.mxu1 %vm5366_vm0, %v5367_v1 }
 0x59d   : > { %4485 = vmatprep.subr.mxu1 %v5367_v1 }
 0x59f   : > { %4472 = vmatmul.mubr.msk.f32.vlgmr.msra.gmra.mrb[14].mxu1 %vm906_vm5, %v5827_v10 }
 0x5a0   : > { %4486 = vmatpush3.msra.mxu1 %v902_v44  ;;  %4487 = vmatprep.mubr.msk.f32.mxu1 %vm5366_vm0, %v5367_v1 }
 0x5a1   : > { %4848 = vmatprep.subr.bf16.mxu1 %v5365_v0 }
 0x5a3   : > { %4488 = vmatmul.mubr.msk.f32.vlgmr.msra.gmra.mrb[16].mxu1 %vm906_vm5, %v5835_v11 }
 0x5a4   : > { %4498 = vmatprep.mubr.msk.f32.mxu1 %vm5366_vm0, %v5367_v1  ;;  %4850 = vmatpush3.bf16.msra.mxu1 %v5846_v17 }
 0x5a5   : > { %4851 = vmatprep.subr.bf16.mxu1 %v5365_v0 }
 0x5a8   : > { %4853 = vmatpush3.bf16.msra.mxu1 %v5850_v20 }
 0x5a9   : > { %4858 = vmatprep.subr.bf16.mxu1 %v5365_v0 }
 0x666   : > { %v1130_v21 = vpop.f32.mrb[10].mxu1 }
 0x667   : > { %v4457_v22 = vpop.f32.mrb[11].mxu1 }
 0x66e   : > { %v1203_v26 = vpop.f32.mrb[12].mxu1 }
 0x66f   : > { %v1204_v27 = vadd.f32 %v1203_v26, %v1130_v21  ;;  %v4468_v28 = vpop.f32.mrb[13].mxu1 }
 0x672   : > { %v1276_v30 = vpop.f32.mrb[14].mxu1 }
 0x673   : > { %v4473_v31 = vpop.f32.mrb[15].mxu1  ;;  %4483 = vmatmul.mubr.msk.f32.vlgmr.msra.gmra.mrb[4].mxu0 %vm740_vm1, %v1276_v30 }
 0x674   : > { %4857 = vmatpush3.bf16.xpose.msk.msra.mxu0 %vm5753_vm2, %v4855_v29  ;;  %4505 = vmatprep.mubr.msk.f32.mxu0 %vm5366_vm0, %v5367_v1 }
 0x675   : > { %4515 = vmatprep.subr.mxu0 %v5367_v1 }
 0x676   : > { %v1427_v32 = vpop.f32.mrb[16].mxu1 }
 0x677   : > { %4499 = vmatmul.mubr.msk.f32.vlgmr.msra.gmra.mrb[18].mxu1 %vm740_vm1, %v1427_v32  ;;  %v4489_v33 = vpop.f32.mrb[17].mxu1 }
 0x678   : > { %4512 = vmatprep.mubr.msk.f32.mxu1 %vm5366_vm0, %v5367_v1 }
 0x67b   : > { %4506 = vmatmul.mubr.msk.f32.vlgmr.msra.gmra.mrb[6].mxu0 %vm740_vm1, %v1548_v35 }
 0x67c   : > { %4517 = vmatprep.mubr.msk.f32.mxu0 %vm5366_vm0, %v5367_v1 }
 0x746   : > { %v1353_v36 = vpop.f32.mrb[4].mxu0 }
 0x747   : > { %v1357_v37 = vadd.f32 %v1353_v36, %v1204_v27  ;;  %v4484_v38 = vpop.f32.mrb[5].mxu0 }
 0x74a   : > { %v1504_v39 = vpop.f32.mrb[18].mxu1 }
 0x74b   : > { %v5866_v40 = vadd.f32 %v1504_v39, %v1357_v37  ;;  %v4500_v41 = vpop.f32.mrb[19].mxu1 }
 0x74e   : > { %v1625_v42 = vpop.f32.mrb[6].mxu0 }
 0x74f   : > { %v1629_v44 = vmul.f32 0.17677669, %v1625_v42  ;;  %v4507_v45 = vpop.f32.mrb[7].mxu0 }
 0x751   : > { %v1630_v46 = vsel %vm821_vm3, %v1629_v44, -inf }
 0x752   : > { %1631 = vmax.xlane.f32.xlu0 %v1630_v46 }
 0x768   : > { %5053 = vrot.lane.b32.xlu0 %v5778_v34, %s5368_s23  ;;  %s3905_s23 = scalar_lea.sflag [#allocation4], %s5697_s20 }
 0x76c   : > { %5058 = vrot.lane.b32.xlu0 %v5759_v58, %s5369_s24 }
 0x770   : > { %2334 = vrot.lane.b32.xlu0 %v5757_v56, %s5369_s24 }
 0x7df   : > { %v1632_v47 = vpop.xlane.xlu0 %1631 }
 0x7e0   : > { %v1633_v50 = vsub.f32 %v1629_v44, %v1632_v47 }
 0x7e2   : > { %v1634_v51 = vmul.f32 1.442695, %v1633_v50 }
 0x7e3   : > { %v5054_v54 = vpop.permute.xlu0 %5053 }
 0x7e4   : > { %5081 = vpow2.f32 %v1634_v51  ;;  %v5056_v57 = vunpack.i.h.bf16 %v5054_v54  ;;  %v5055_v60 = vunpack.i.l.bf16 %v5054_v54 }
 0x7e6   : > { %v4859_v61 = vpack.c.bf16 %v5056_v57, %v5055_v60 }
 0x7e7   : > { %v5059_v16 = vpop.permute.xlu0 %5058 }
 0x7e8   : > { %4860 = vmatpush3.bf16.msra.mxu1 %v4859_v61  ;;  %v5061_v18 = vunpack.i.h.bf16 %v5059_v16  ;;  %v5060_v19 = vunpack.i.l.bf16 %v5059_v16 }
 0x7e9   : > { %4520 = vmatprep.subr.mxu1 %v5367_v1 }
 0x7ea   : > { %v4886_v26 = vpack.c.bf16 %v5061_v18, %v5060_v19 }
 0x7eb   : > { %v2335_v31 = vpop.permute.xlu0 %2334 }
 0x7ee   : > { %v5082_v62 = vpop.eup %5081 }
 0x7ef   : > { %v1636_v63 = vsel %vm821_vm3, %v5082_v62, 0.0 }
 0x7f0   : > { %1637 = vadd.xlane.f32.xlu1 %v1636_v63 }
 0x87d   : > { %v1638_v3 = vpop.xlane.xlu1 %1637 }
 0x87e   : > { %5083 = vrcp.f32 %v1638_v3 }
 0x888   : > { %v5084_v4 = vpop.eup %5083 }
 0x889   : > { %v1640_v5 = vmul.f32 %v5084_v4, %v5082_v62 }
 0x88b   : > { %4513 = vmatmul.mubr.msk.f32.vlgmr.msra.gmra.mrb[20].mxu1 %vm821_vm3, %v1640_v5 }
 0x88c   : > { %4522 = vmatprep.mubr.msk.f32.mxu1 %vm5366_vm0, %v5367_v1 }
 0x95e   : > { %v1718_v6 = vpop.f32.mrb[20].mxu1 }
 0x95f   : > { %v4514_v8 = vpop.f32.mrb[21].mxu1  ;;  %4516 = vmatpush3.msra.mxu0 %v1718_v6  ;;  %4521 = vmatpush3.msra.mxu1 %v1718_v6 }
 0x960   : > { %4518 = vmatmul.mubr.msk.f32.vlgmr.msra.gmra.mrb[8].mxu0 %vm906_vm5, %v5785_v43  ;;  %4523 = vmatmul.mubr.msk.f32.vlgmr.msra.gmra.mrb[22].mxu1 %vm906_vm5, %v5793_v48 }
 0x961   : > { %4861 = vmatprep.subr.bf16.mxu0 %v5365_v0  ;;  %4867 = vmatprep.subr.bf16.mxu1 %v5365_v0 }
 0x962   : > { %4863 = vmatpush3.bf16.msra.mxu0 %v5795_v49  ;;  %4869 = vmatpush3.bf16.msra.mxu1 %v5812_v2 }
 0x963   : > { %4864 = vmatprep.subr.bf16.mxu0 %v5365_v0  ;;  %4870 = vmatprep.subr.bf16.mxu1 %v5365_v0 }
 0x964   : > { %4533 = vmatprep.mubr.msk.f32.mxu0 %vm5366_vm0, %v5367_v1  ;;  %4544 = vmatprep.mubr.msk.f32.mxu1 %vm5366_vm0, %v5367_v1 }
 0x966   : > { %4866 = vmatpush3.bf16.msra.mxu0 %v5804_v53  ;;  %4872 = vmatpush3.bf16.msra.mxu1 %v5816_v7 }
 0x967   : > { %4547 = vmatprep.subr.mxu0 %v5367_v1  ;;  %4873 = vmatprep.subr.bf16.mxu1 %v5365_v0 }
 0xa33   : > { %v1788_v9 = vpop.f32.mrb[8].mxu0  ;;  %v1862_v12 = vpop.f32.mrb[22].mxu1 }
 0xa34   : > { %v4524_v13 = vpop.f32.mrb[23].mxu1  ;;  %4534 = vmatmul.mubr.msk.f32.vlgmr.msra.gmra.mrb[10].mxu0 %vm740_vm1, %v1862_v12  ;;  %4545 = vmatmul.mubr.msk.f32.vlgmr.msra.gmra.mrb[24].mxu1 %vm740_vm1, %v1788_v9  ;;  %v4519_v15 = vpop.f32.mrb[9].mxu0 }
 0xa35   : > { %4548 = vmatpush3.msra.mxu0 %v1718_v6  ;;  %4549 = vmatprep.mubr.msk.f32.mxu0 %vm5366_vm0, %v5367_v1 }
 0xa36   : > { %4563 = vmatprep.subr.mxu0 %v5367_v1  ;;  %4875 = vmatpush3.bf16.msra.mxu1 %v5808_v59 }
 0xa37   : > { %4876 = vmatprep.subr.bf16.mxu1 %v5365_v0  ;;  %4560 = vmatprep.mubr.msk.f32.mxu1 %vm5366_vm0, %v5367_v1 }
 0xa38   : > { %4550 = vmatmul.mubr.msk.f32.vlgmr.msra.gmra.mrb[12].mxu0 %vm906_vm5, %v5827_v10 }
 0xa39   : > { %4564 = vmatpush3.msra.mxu0 %v1718_v6  ;;  %4565 = vmatprep.mubr.msk.f32.mxu0 %vm5366_vm0, %v5367_v1 }
 0xa3a   : > { %4878 = vmatpush3.bf16.msra.mxu1 %v5842_v14  ;;  %4879 = vmatprep.subr.bf16.mxu0 %v5365_v0 }
 0xa3b   : > { %4885 = vmatprep.subr.bf16.mxu1 %v5365_v0 }
 0xa3c   : > { %4566 = vmatmul.mubr.msk.f32.vlgmr.msra.gmra.mrb[14].mxu0 %vm906_vm5, %v5835_v11 }
 0xa3d   : > { %4881 = vmatpush3.bf16.msra.mxu0 %v5846_v17  ;;  %4576 = vmatprep.mubr.msk.f32.mxu0 %vm5366_vm0, %v5367_v1 }
 0xa3e   : > { %4882 = vmatprep.subr.bf16.mxu0 %v5365_v0 }
 0xa41   : > { %4884 = vmatpush3.bf16.msra.mxu0 %v5850_v20 }
 0xa42   : > { %4889 = vmatprep.subr.bf16.mxu0 %v5365_v0 }
 0xb07   : > { %v1939_v21 = vpop.f32.mrb[10].mxu0  ;;  %v2012_v22 = vpop.f32.mrb[24].mxu1 }
 0xb08   : > { %v2013_v23 = vadd.f32 %v2012_v22, %v1939_v21  ;;  %v4535_v24 = vpop.f32.mrb[11].mxu0  ;;  %v4546_v25 = vpop.f32.mrb[25].mxu1 }
 0xb0b   : > { %v2082_v27 = vpop.f32.mrb[12].mxu0 }
 0xb0c   : > { %v4551_v28 = vpop.f32.mrb[13].mxu0  ;;  %4561 = vmatmul.mubr.msk.f32.vlgmr.msra.gmra.mrb[26].mxu1 %vm740_vm1, %v2082_v27 }
 0xb0d   : > { %4888 = vmatpush3.bf16.xpose.msk.msra.mxu1 %vm5753_vm2, %v4886_v26  ;;  %4583 = vmatprep.mubr.msk.f32.mxu1 %vm5366_vm0, %v5367_v1 }
 0xb0e   : > { %4593 = vmatprep.subr.mxu1 %v5367_v1 }
 0xb0f   : > { %v2230_v29 = vpop.f32.mrb[14].mxu0 }
 0xb10   : > { %4577 = vmatmul.mubr.msk.f32.vlgmr.msra.gmra.mrb[16].mxu0 %vm740_vm1, %v2230_v29  ;;  %v4567_v30 = vpop.f32.mrb[15].mxu0 }
 0xb11   : > { %4590 = vmatprep.mubr.msk.f32.mxu0 %vm5366_vm0, %v5367_v1 }
 0xb14   : > { %4584 = vmatmul.mubr.msk.f32.vlgmr.msra.gmra.mrb[28].mxu1 %vm740_vm1, %v2335_v31 }
 0xb15   : > { %4595 = vmatprep.mubr.msk.f32.mxu1 %vm5366_vm0, %v5367_v1 }
 0xbdf   : > { %v2159_v32 = vpop.f32.mrb[26].mxu1 }
 0xbe0   : > { %v2163_v33 = vadd.f32 %v2159_v32, %v2013_v23  ;;  %v4562_v35 = vpop.f32.mrb[27].mxu1 }
 0xbe3   : > { %v2307_v36 = vpop.f32.mrb[16].mxu0 }
 0xbe4   : > { %v5934_v37 = vadd.f32 %v2307_v36, %v2163_v33  ;;  %v4578_v38 = vpop.f32.mrb[17].mxu0 }
 0xbe7   : > { %v2412_v39 = vpop.f32.mrb[28].mxu1 }
 0xbe8   : > { %v2416_v41 = vmul.f32 0.17677669, %v2412_v39  ;;  %v4585_v42 = vpop.f32.mrb[29].mxu1  ;;  %v6008_v39 = vld [vmem:[%s6149_s6] ss:$0 sm:$0xff] }
 0xbea   : > { %v2417_v44 = vsel %vm821_vm3, %v2416_v41, -inf }
 0xbeb   : > { %2418 = vmax.xlane.f32.xlu0 %v2417_v44 }
 0xc78   : > { %v2419_v45 = vpop.xlane.xlu0 %2418 }
 0xc79   : > { %v2420_v46 = vsub.f32 %v2416_v41, %v2419_v45  ;;  %v1515_v41 = vadd.f32 %v6008_v39, %v5866_v40 }
 0xc7b   : > { %v2421_v47 = vmul.f32 1.442695, %v2420_v46  ;;  %v6013_v42 = vadd.f32 %v1515_v41, %v5744_v52 }
 0xc7d   : > { %5085 = vpow2.f32 %v2421_v47  ;;  %v1518_v44 = vsel %vm1517_vm9, %v6013_v42, 0.0 }
 0xc87   : > { %v5086_v50 = vpop.eup %5085 }
 0xc88   : > { %v2423_v51 = vsel %vm821_vm3, %v5086_v50, 0.0 }
 0xc89   : > { %2424 = vadd.xlane.f32.xlu1 %v2423_v51 }
 0xc9a   : > { %5063 = vrot.lane.b32.xlu1 %v5778_v34, %s5369_s24  ;;  %s5273_s24 = scalar_lea.vmem %s6101_s0, 128 }
 0xc9b   : > { %p5274_p6 = scmp.ne.s32.totalorder %s6101_s0, %s5273_s24 }
 0xc9d   : > { %p5275_p4 = pnand %p5274_p6, %p6190_p2 }
 0xc9e   : > { %5068 = vrot.lane.b32.xlu1 %v5759_v58, %s5370_s14 }
 0xc9f   : > { %p5276_p10 = pneg %p5275_p4 }
 0xca2   : > { %3119 = vrot.lane.b32.xlu1 %v5757_v56, %s5370_s14 }
 0xd16   : > { %v2425_v54 = vpop.xlane.xlu1 %2424 }
 0xd17   : > { %5087 = vrcp.f32 %v2425_v54 }
 0xd1a   : > { %v5064_v57 = vpop.permute.xlu1 %5063 }
 0xd1b   : > { %v5066_v60 = vunpack.i.h.bf16 %v5064_v57  ;;  %v5065_v61 = vunpack.i.l.bf16 %v5064_v57  ;;  %v2312_v57 = vadd.f32 %v6008_v39, %v5934_v37 }
 0xd1d   : > { %v4890_v62 = vpack.c.bf16 %v5066_v60, %v5065_v61  ;;  %v2314_v40 = vrot.slane %v2312_v57, 6 }
 0xd1e   : > { %v5069_v9 = vpop.permute.xlu1 %5068 }
 0xd1f   : > { %4891 = vmatpush3.bf16.msra.mxu0 %v4890_v62  ;;  %v5071_v12 = vunpack.i.h.bf16 %v5069_v9  ;;  %v5070_v13 = vunpack.i.l.bf16 %v5069_v9 }
 0xd20   : > { %4598 = vmatprep.subr.mxu0 %v5367_v1 }
 0xd21   : > { %v5088_v63 = vpop.eup %5087  ;;  %v4917_v22 = vpack.c.bf16 %v5071_v12, %v5070_v13 }
 0xd22   : > { %v2427_v3 = vmul.f32 %v5088_v63, %v5086_v50  ;;  %v3120_v27 = vpop.permute.xlu1 %3119 }
 0xd24   : > { %4591 = vmatmul.mubr.msk.f32.vlgmr.msra.gmra.mrb[18].mxu0 %vm821_vm3, %v2427_v3  ;;  %v6023_v3 = vadd.f32 %v2314_v40, %v5744_v52 }
 0xd25   : > { %4600 = vmatprep.mubr.msk.f32.mxu0 %vm5366_vm0, %v5367_v1 }
 0xdf7   : > { %v2503_v58 = vpop.f32.mrb[18].mxu0 }
 0xdf8   : > { %v4592_v4 = vpop.f32.mrb[19].mxu0  ;;  %4594 = vmatpush3.msra.mxu1 %v2503_v58  ;;  %4599 = vmatpush3.msra.mxu0 %v2503_v58 }
 0xdf9   : > { %4596 = vmatmul.mubr.msk.f32.vlgmr.msra.gmra.mrb[30].mxu1 %vm906_vm5, %v5785_v43  ;;  %4601 = vmatmul.mubr.msk.f32.vlgmr.msra.gmra.mrb[20].mxu0 %vm906_vm5, %v5793_v48 }
 0xdfa   : > { %4892 = vmatprep.subr.bf16.mxu1 %v5365_v0  ;;  %4898 = vmatprep.subr.bf16.mxu0 %v5365_v0 }
 0xdfb   : > { %4894 = vmatpush3.bf16.msra.mxu1 %v5795_v49  ;;  %4900 = vmatpush3.bf16.msra.mxu0 %v5812_v2 }
 0xdfc   : > { %4895 = vmatprep.subr.bf16.mxu1 %v5365_v0  ;;  %4901 = vmatprep.subr.bf16.mxu0 %v5365_v0 }
 0xdfd   : > { %4611 = vmatprep.mubr.msk.f32.mxu1 %vm5366_vm0, %v5367_v1  ;;  %4622 = vmatprep.mubr.msk.f32.mxu0 %vm5366_vm0, %v5367_v1 }
 0xdff   : > { %4897 = vmatpush3.bf16.msra.mxu1 %v5804_v53  ;;  %4903 = vmatpush3.bf16.msra.mxu0 %v5816_v7 }
 0xe00   : > { %4625 = vmatprep.subr.mxu1 %v5367_v1  ;;  %4904 = vmatprep.subr.bf16.mxu0 %v5365_v0 }
 0xecc   : > { %v2573_v56 = vpop.f32.mrb[30].mxu1  ;;  %v2647_v5 = vpop.f32.mrb[20].mxu0 }
 0xecd   : > { %v4602_v6 = vpop.f32.mrb[21].mxu0  ;;  %4612 = vmatmul.mubr.msk.f32.vlgmr.msra.gmra.mrb[32].mxu1 %vm740_vm1, %v2647_v5  ;;  %4623 = vmatmul.mubr.msk.f32.vlgmr.msra.gmra.mrb[22].mxu0 %vm740_vm1, %v2573_v56  ;;  %v4597_v8 = vpop.f32.mrb[31].mxu1 }
 0xece   : > { %4626 = vmatpush3.msra.mxu1 %v2503_v58  ;;  %4627 = vmatprep.mubr.msk.f32.mxu1 %vm5366_vm0, %v5367_v1 }
 0xecf   : > { %4641 = vmatprep.subr.mxu1 %v5367_v1  ;;  %4906 = vmatpush3.bf16.msra.mxu0 %v5808_v59 }
 0xed0   : > { %4907 = vmatprep.subr.bf16.mxu0 %v5365_v0  ;;  %4638 = vmatprep.mubr.msk.f32.mxu0 %vm5366_vm0, %v5367_v1 }
 0xed1   : > { %4628 = vmatmul.mubr.msk.f32.vlgmr.msra.gmra.mrb[34].mxu1 %vm906_vm5, %v5827_v10 }
 0xed2   : > { %4642 = vmatpush3.msra.mxu1 %v2503_v58  ;;  %4643 = vmatprep.mubr.msk.f32.mxu1 %vm5366_vm0, %v5367_v1  ;;  %v2318_v58 = vsel %vm2317_vm10, %v6023_v3, 0.0 }
 0xed3   : > { %4909 = vmatpush3.bf16.msra.mxu0 %v5842_v14  ;;  %4910 = vmatprep.subr.bf16.mxu1 %v5365_v0 }
 0xed4   : > { %4916 = vmatprep.subr.bf16.mxu0 %v5365_v0 }
 0xed5   : > { %4644 = vmatmul.mubr.msk.f32.vlgmr.msra.gmra.mrb[36].mxu1 %vm906_vm5, %v5835_v11 }
 0xed6   : > { %4912 = vmatpush3.bf16.msra.mxu1 %v5846_v17  ;;  %4654 = vmatprep.mubr.msk.f32.mxu1 %vm5366_vm0, %v5367_v1 }
 0xed7   : > { %4913 = vmatprep.subr.bf16.mxu1 %v5365_v0 }
 0xeda   : > { %4915 = vmatpush3.bf16.msra.mxu1 %v5850_v20 }
 0xedb   : > { %4920 = vmatprep.subr.bf16.mxu1 %v5365_v0 }
 0xfa0   : > { %v2724_v15 = vpop.f32.mrb[32].mxu1  ;;  %v2797_v16 = vpop.f32.mrb[22].mxu0 }
 0xfa1   : > { %v2798_v18 = vadd.f32 %v2797_v16, %v2724_v15  ;;  %v4613_v19 = vpop.f32.mrb[33].mxu1  ;;  %v4624_v21 = vpop.f32.mrb[23].mxu0 }
 0xfa4   : > { %v2867_v23 = vpop.f32.mrb[34].mxu1 }
 0xfa5   : > { %v4629_v24 = vpop.f32.mrb[35].mxu1  ;;  %4639 = vmatmul.mubr.msk.f32.vlgmr.msra.gmra.mrb[24].mxu0 %vm740_vm1, %v2867_v23 }
 0xfa6   : > { %4919 = vmatpush3.bf16.xpose.msk.msra.mxu0 %vm5753_vm2, %v4917_v22  ;;  %4661 = vmatprep.mubr.msk.f32.mxu0 %vm5366_vm0, %v5367_v1 }
 0xfa7   : > { %4671 = vmatprep.subr.mxu0 %v5367_v1 }
 0xfa8   : > { %v3015_v25 = vpop.f32.mrb[36].mxu1 }
 0xfa9   : > { %4655 = vmatmul.mubr.msk.f32.vlgmr.msra.gmra.mrb[38].mxu1 %vm740_vm1, %v3015_v25  ;;  %v4645_v26 = vpop.f32.mrb[37].mxu1 }
 0xfaa   : > { %4668 = vmatprep.mubr.msk.f32.mxu1 %vm5366_vm0, %v5367_v1 }
 0xfad   : > { %4662 = vmatmul.mubr.msk.f32.vlgmr.msra.gmra.mrb[26].mxu0 %vm740_vm1, %v3120_v27 }
 0xfae   : > { %4673 = vmatprep.mubr.msk.f32.mxu0 %vm5366_vm0, %v5367_v1 }
0x1078   : > { %v2944_v55 = vpop.f32.mrb[24].mxu0 }
0x1079   : > { %v2948_v28 = vadd.f32 %v2944_v55, %v2798_v18  ;;  %v4640_v29 = vpop.f32.mrb[25].mxu0 }
0x107c   : > { %v3092_v30 = vpop.f32.mrb[38].mxu1 }
0x107d   : > { %v3096_v31 = vadd.f32 %v3092_v30, %v2948_v28  ;;  %v4656_v32 = vpop.f32.mrb[39].mxu1 }
0x107f   : > { %v3097_v60 = vadd.f32 %v6008_v39, %v3096_v31 }
0x1080   : > { %v3197_v33 = vpop.f32.mrb[26].mxu0 }
0x1081   : > { %v3201_v35 = vmul.f32 0.17677669, %v3197_v33  ;;  %v4663_v36 = vpop.f32.mrb[27].mxu0  ;;  %v3099_v62 = vrot.slane %v3097_v60, 4 }
0x1083   : > { %v3202_v38 = vsel %vm821_vm3, %v3201_v35, -inf  ;;  %v6028_v37 = vadd.f32 %v3099_v62, %v5744_v52  ;;  %v4086_v62 = vld [vmem:[%s6150_s7] ss:$0 sm:$0xff] }
0x1084   : > { %3203 = vmax.xlane.f32.xlu0 %v3202_v38 }
0x1085   : > { %v3103_v4 = vsel %vm3102_vm11, %v6028_v37, 0.0 }
0x109a   : > { %5073 = vrot.lane.b32.xlu0 %v5778_v34, %s5370_s14  ;;  %s5277_s14 = sshll.u32 %s5371_s15, 4  ;;  %s5278_s14 = int_to_ptr.vmem [resolvable:$false] %s5277_s14 }
0x109b   : > { %s5279_s21 = scalar_lea.vmem %s5278_s14, 256  ;;  %p5280_p5 = scmp.lt.s32.totalorder %s6101_s0, %s5278_s14 }
0x109c   : > { %p5281_p7 = scmp.lt.s32.totalorder %s5279_s21, %s5273_s24 }
0x109e   : > { %p5282_p9 = por %p5281_p7, %p5280_p5 }
0x10a0   : > { %p5283_p1 = pnand %p5282_p9, %p5276_p10 }
0x10b9   : > { %1519 = vadd.xlane.f32.xlu0 %v1518_v44 }
0x1111   : > { %v3204_v45 = vpop.xlane.xlu0 %3203 }
0x1112   : > { %v3205_v46 = vsub.f32 %v3201_v35, %v3204_v45 }
0x1114   : > { %v3206_v47 = vmul.f32 1.442695, %v3205_v46 }
0x1115   : > { %v5074_v34 = vpop.permute.xlu0 %5073 }
0x1116   : > { %5089 = vpow2.f32 %v3206_v47  ;;  %v5076_v50 = vunpack.i.h.bf16 %v5074_v34  ;;  %v5075_v51 = vunpack.i.l.bf16 %v5074_v34 }
0x1118   : > { %v4921_v54 = vpack.c.bf16 %v5076_v50, %v5075_v51 }
0x111a   : > { %4922 = vmatpush3.bf16.msra.mxu1 %v4921_v54 }
0x111b   : > { %4676 = vmatprep.subr.mxu1 %v5367_v1 }
0x1120   : > { %v5090_v61 = vpop.eup %5089 }
0x1121   : > { %v3208_v63 = vsel %vm821_vm3, %v5090_v61, 0.0 }
0x1122   : > { %3209 = vadd.xlane.f32.xlu1 %v3208_v63 }
0x1126   : > { %2319 = vadd.xlane.f32.xlu1 %v2318_v58 }
0x112a   : > { %3104 = vadd.xlane.f32.xlu1 %v3103_v4 }
0x1146   : > { %v1520_v18 = vpop.xlane.xlu0 %1519 }
0x11af   : > { %v3210_v56 = vpop.xlane.xlu1 %3209 }
0x11b0   : > { %5091 = vrcp.f32 %v3210_v56 }
0x11ba   : > { %v5092_v5 = vpop.eup %5091 }
0x11bb   : > { %v3212_v6 = vmul.f32 %v5092_v5, %v5090_v61 }
0x11bd   : > { %4669 = vmatmul.mubr.msk.f32.vlgmr.msra.gmra.mrb[40].mxu1 %vm821_vm3, %v3212_v6 }
0x11be   : > { %4678 = vmatprep.mubr.msk.f32.mxu1 %vm5366_vm0, %v5367_v1 }
0x1290   : > { %v3288_v8 = vpop.f32.mrb[40].mxu1 }
0x1291   : > { %v4670_v9 = vpop.f32.mrb[41].mxu1  ;;  %4672 = vmatpush3.msra.mxu0 %v3288_v8  ;;  %4677 = vmatpush3.msra.mxu1 %v3288_v8 }
0x1292   : > { %4679 = vmatmul.mubr.msk.f32.vlgmr.msra.gmra.mrb[42].mxu1 %vm906_vm5, %v5793_v48  ;;  %4674 = vmatmul.mubr.msk.f32.vlgmr.msra.gmra.mrb[28].mxu0 %vm906_vm5, %v5785_v43 }
0x1293   : > { %4923 = vmatprep.subr.bf16.mxu0 %v5365_v0  ;;  %4929 = vmatprep.subr.bf16.mxu1 %v5365_v0 }
0x1294   : > { %4925 = vmatpush3.bf16.msra.mxu0 %v5795_v49  ;;  %4931 = vmatpush3.bf16.msra.mxu1 %v5812_v2 }
0x1295   : > { %4926 = vmatprep.subr.bf16.mxu0 %v5365_v0  ;;  %4689 = vmatprep.mubr.msk.f32.mxu0 %vm5366_vm0, %v5367_v1 }
0x1296   : > { %4932 = vmatprep.subr.bf16.mxu1 %v5365_v0  ;;  %4700 = vmatprep.mubr.msk.f32.mxu1 %vm5366_vm0, %v5367_v1 }
0x1298   : > { %4928 = vmatpush3.bf16.msra.mxu0 %v5804_v53  ;;  %4934 = vmatpush3.bf16.msra.mxu1 %v5816_v7 }
0x1299   : > { %4703 = vmatprep.subr.mxu0 %v5367_v1  ;;  %4935 = vmatprep.subr.bf16.mxu1 %v5365_v0 }
0x1365   : > { %v3432_v43 = vpop.f32.mrb[42].mxu1  ;;  %v3358_v48 = vpop.f32.mrb[28].mxu0 }
0x1366   : > { %4690 = vmatmul.mubr.msk.f32.vlgmr.msra.gmra.mrb[30].mxu0 %vm740_vm1, %v3432_v43  ;;  %v4680_v49 = vpop.f32.mrb[43].mxu1  ;;  %4701 = vmatmul.mubr.msk.f32.vlgmr.msra.gmra.mrb[44].mxu1 %vm740_vm1, %v3358_v48  ;;  %v4675_v2 = vpop.f32.mrb[29].mxu0 }
0x1367   : > { %4704 = vmatpush3.msra.mxu0 %v3288_v8  ;;  %4705 = vmatprep.mubr.msk.f32.mxu0 %vm5366_vm0, %v5367_v1 }
0x1368   : > { %4719 = vmatprep.subr.mxu0 %v5367_v1  ;;  %4937 = vmatpush3.bf16.msra.mxu1 %v5808_v59 }
0x1369   : > { %4938 = vmatprep.subr.bf16.mxu1 %v5365_v0  ;;  %4716 = vmatprep.mubr.msk.f32.mxu1 %vm5366_vm0, %v5367_v1 }
0x136a   : > { %4706 = vmatmul.mubr.msk.f32.vlgmr.msra.gmra.mrb[32].mxu0 %vm906_vm5, %v5827_v10 }
0x136b   : > { %4720 = vmatpush3.msra.mxu0 %v3288_v8  ;;  %4721 = vmatprep.mubr.msk.f32.mxu0 %vm5366_vm0, %v5367_v1 }
0x136c   : > { %4941 = vmatprep.subr.bf16.mxu0 %v5365_v0  ;;  %4940 = vmatpush3.bf16.msra.mxu1 %v5842_v14 }
0x136e   : > { %4722 = vmatmul.mubr.msk.f32.vlgmr.msra.gmra.mrb[34].mxu0 %vm906_vm5, %v5835_v11 }
0x136f   : > { %4943 = vmatpush3.bf16.msra.mxu0 %v5846_v17  ;;  %4732 = vmatprep.mubr.msk.f32.mxu0 %vm5366_vm0, %v5367_v1 }
0x1370   : > { %4944 = vmatprep.subr.bf16.mxu0 %v5365_v0  ;;  %v2320_v0 = vpop.xlane.xlu1 %2319 }
0x1371   : > { %v2321_v25 = vmul.f32 0.0078125, %v2320_v0 }
0x1373   : > { %4946 = vmatpush3.bf16.msra.mxu0 %v5850_v20  ;;  %v1522_v20 = vmul.f32 0.0078125, %v1520_v18  ;;  %v2322_v28 = vsub.f32 %v6023_v3, %v2321_v25  ;;  %v4087_v3 = vld [vmem:[%s6151_s8] ss:$0 sm:$0xff] }
0x1374   : > { %v3105_v27 = vpop.xlane.xlu1 %3104 }
0x1375   : > { %v1523_v24 = vsub.f32 %v6013_v42, %v1522_v20  ;;  %v3106_v29 = vmul.f32 0.0078125, %v3105_v27  ;;  %v2323_v35 = vmul.f32 %v2322_v28, %v2322_v28 }
0x1377   : > { %v1524_v31 = vmul.f32 %v1523_v24, %v1523_v24  ;;  %v3107_v32 = vsub.f32 %v6028_v37, %v3106_v29  ;;  %v2324_v36 = vsel %vm2317_vm10, %v2323_v35, 0.0 }
0x1379   : > { %v1525_v33 = vsel %vm1517_vm9, %v1524_v31, 0.0  ;;  %v3108_v38 = vmul.f32 %v3107_v32, %v3107_v32 }
0x1439   : > { %v3509_v53 = vpop.f32.mrb[30].mxu0  ;;  %v3582_v59 = vpop.f32.mrb[44].mxu1 }
0x143a   : > { %v4691_v7 = vpop.f32.mrb[31].mxu0  ;;  %v3583_v10 = vadd.f32 %v3582_v59, %v3509_v53  ;;  %v4702_v12 = vpop.f32.mrb[45].mxu1 }
0x143d   : > { %v3652_v13 = vpop.f32.mrb[32].mxu0 }
0x143e   : > { %4717 = vmatmul.mubr.msk.f32.vlgmr.msra.gmra.mrb[46].mxu1 %vm740_vm1, %v3652_v13  ;;  %v4707_v14 = vpop.f32.mrb[33].mxu0 }
0x1441   : > { %v3800_v15 = vpop.f32.mrb[34].mxu0 }
0x1442   : > { %4733 = vmatmul.mubr.msk.f32.vlgmr.msra.gmra.mrb[36].mxu0 %vm740_vm1, %v3800_v15  ;;  %v4723_v11 = vpop.f32.mrb[35].mxu0 }
0x1511   : > { %v3729_v17 = vpop.f32.mrb[46].mxu1 }
0x1512   : > { %v3733_v16 = vadd.f32 %v3729_v17, %v3583_v10  ;;  %v4718_v1 = vpop.f32.mrb[47].mxu1 }
0x1515   : > { %v3877_v19 = vpop.f32.mrb[36].mxu0 }
0x1516   : > { %v3881_v21 = vadd.f32 %v3877_v19, %v3733_v16  ;;  %v4734_v22 = vpop.f32.mrb[37].mxu0 }
0x1518   : > { %v3882_v23 = vadd.f32 %v6008_v39, %v3881_v21  ;;  %v3109_v39 = vsel %vm3102_vm11, %v3108_v38, 0.0 }
0x151a   : > { %v3884_v26 = vrot.slane %v3882_v23, 2 }
0x151c   : > { %v3886_v55 = vadd.f32 %v3884_v26, %v5744_v52 }
0x151e   : > { %v3888_v30 = vsel %vm3887_vm12, %v3886_v55, 0.0 }
0x151f   : > { %3889 = vadd.xlane.f32.xlu1 %v3888_v30 }
0x1523   : > { %1526 = vadd.xlane.f32.xlu1 %v1525_v33 }
0x1527   : > { %2325 = vadd.xlane.f32.xlu1 %v2324_v36 }
0x152b   : > { %3110 = vadd.xlane.f32.xlu1 %v3109_v39 }
0x15ac   : > { %v3890_v52 = vpop.xlane.xlu1 %3889 }
0x15ad   : > { %v3891_v41 = vmul.f32 0.0078125, %v3890_v52 }
0x15af   : > { %v3892_v42 = vsub.f32 %v3886_v55, %v3891_v41 }
0x15b0   : > { %v1527_v44 = vpop.xlane.xlu1 %1526 }
0x15b1   : > { %v1528_v45 = vmul.f32 0.0078125, %v1527_v44  ;;  %v3893_v46 = vmul.f32 %v3892_v42, %v3892_v42 }
0x15b3   : > { %v1529_v47 = vadd.f32 1e-05, %v1528_v45  ;;  %v3894_v34 = vsel %vm3887_vm12, %v3893_v46, 0.0 }
0x15b4   : > { %3895 = vadd.xlane.f32.xlu0 %v3894_v34  ;;  %v2326_v50 = vpop.xlane.xlu1 %2325 }
0x15b5   : > { %5093 = vrsqrt.f32 %v1529_v47  ;;  %v2327_v51 = vmul.f32 0.0078125, %v2326_v50 }
0x15b7   : > { %v2328_v54 = vadd.f32 1e-05, %v2327_v51 }
0x15b8   : > { %v3111_v57 = vpop.xlane.xlu1 %3110 }
0x15b9   : > { %5095 = vrsqrt.f32 %v2328_v54  ;;  %v3112_v40 = vmul.f32 0.0078125, %v3111_v57 }
0x15bb   : > { %v3113_v60 = vadd.f32 1e-05, %v3112_v40 }
0x15bd   : > { %5097 = vrsqrt.f32 %v3113_v60 }
0x15bf   : > { %v5094_v61 = vpop.eup %5093 }
0x15c0   : > { %v1531_v63 = vmul.f32 %v5094_v61, %v1523_v24 }
0x15c2   : > { %v1538_v58 = vmul.f32 %v4086_v62, %v1531_v63 }
0x15c3   : > { %v5096_v37 = vpop.eup %5095 }
0x15c4   : > { %v1545_v4 = vadd.f32 %v4087_v3, %v1538_v58  ;;  %v2330_v56 = vmul.f32 %v5096_v37, %v2322_v28 }
0x15c6   : > { %v2331_v5 = vmul.f32 %v4086_v62, %v2330_v56  ;;  %1546 = vst [vmem:[%s445_s19] sm:$0x3] %v1545_v4 }
0x15c7   : > { %v5098_v6 = vpop.eup %5097 }
0x15c8   : > { %v2332_v8 = vadd.f32 %v4087_v3, %v2331_v5  ;;  %v3115_v9 = vmul.f32 %v5098_v6, %v3107_v32 }
0x15ca   : > { %v3116_v43 = vmul.f32 %v4086_v62, %v3115_v9  ;;  %2333 = vst [vmem:[%s445_s19] sm:$0xc] %v2332_v8 }
0x15cc   : > { %v3117_v48 = vadd.f32 %v4087_v3, %v3116_v43 }
0x15ce   : > { %3118 = vst [vmem:[%s445_s19] sm:$0x30] %v3117_v48 }
0x1641   : > { %v3896_v49 = vpop.xlane.xlu0 %3895 }
0x1642   : > { %v3897_v2 = vmul.f32 0.0078125, %v3896_v49 }
0x1644   : > { %v3898_v53 = vadd.f32 1e-05, %v3897_v2 }
0x1646   : > { %5099 = vrsqrt.f32 %v3898_v53 }
0x1650   : > { %v5100_v59 = vpop.eup %5099 }
0x1651   : > { %v3900_v7 = vmul.f32 %v5100_v59, %v3892_v42 }
0x1653   : > { %v3901_v10 = vmul.f32 %v4086_v62, %v3900_v7 }
0x1655   : > { %v3902_v12 = vadd.f32 %v4087_v3, %v3901_v10 }
0x1657   : > { %3903 = vst [vmem:[%s445_s19] sm:$0xc0] %v3902_v12 }
0x1658   : > { %5286 = shalt.err (!%p5283_p1)
}
0x1659   : > { %s5287_s20 = scalar_lea.hbm %s6099_s9, 128  ;;  %s5291_s2 = scalar_lea.hbm %s6189_s26, 256 }
0x165a   : > { %p5288_p11 = scmp.ne.s32.totalorder %s6099_s9, %s5287_s20  ;;  %p5292_p3 = scmp.lt.u32.totalorder %s6099_s9, %s6189_s26 }
0x165b   : > { %p5293_p13 = scmp.lt.u32.totalorder %s5291_s2, %s5287_s20  ;;  %p5295_p6 = scmp.lt.u32.totalorder %s5287_s20, %s6099_s9 }
0x165c   : > { %p5289_p8 = pnand %p5288_p11, %p6190_p2 }
0x165d   : > { %p5294_p0 = por %p5293_p13, %p5292_p3 }
0x165e   : > { %p5290_p12 = pneg %p5289_p8 }
0x165f   : > { %p5296_p4 = por %p5295_p6, %p5294_p0 }
0x1661   : > { %p5297_p10 = pnand %p5296_p4, %p5290_p12 }
0x1663   : > { %5300 = shalt.err (!%p5297_p10)
}
0x1664   : > { %4967 = dma.vmem_to_hbm [thread:$0]  (%p6190_p2), %s6101_s0, 128, %s6099_s9, %s3905_s23  }
0x1665 PF: > { %s3930_s19 = sand.u32 1, %s5343_s30   ;;  %p6191_p5 = scmp.ne.s32.totalorder %s6174_s13, 0 }
0x1666   : > { %p6192_p7 = scmp.ge.s32.totalorder %s5355_s12, 2  ;;  %s3931_s17 = scalar_lea.sflag [#allocation4], %s3930_s19 }
0x1668   : > { %p4990_p9 = pnand %p6192_p7, %p6191_p5 }
0x166a   : > { %5338 = dma.done.wait (!%p4990_p9), %s3931_s17, 128  }
0x166b   : > { %5340 = vsyncadd (!%p4990_p9), %s3931_s17, 4294967168  ;;  %p27_p1 = scmp.ge.s32.totalorder %s5574_s27, 4   ;;  %s6193_s30 = smov %s5347_s10 }
0x166c   : > { %s6194_s10 = smov %s5351_s11  ;;  %s6195_s11 = smov %s5585_s25 }
0x166d   : > { %s6196_s12 = smov %s5574_s27  ;;  %29 = sbr.rel (!%p27_p1) target bundleno = 15 (0xf), region = 130 }
0x1674   :  { %3936 = vsyncpa [#allocation3], 1 }
0x1675   :  { %3938 = vsyncpa [#allocation3 + $0x1], 1 }
0x1676   :  { %3939 = vsyncpa [#allocation6], 1 }
0x1677   :  { %3941 = vsyncpa [#allocation6 + $0x1], 1 }
0x1678   :  { %3942 = vsyncpa [#allocation9], 1 }
0x1679   :  { %3943 = vsyncpa [#allocation12], 1 }
0x167a   :  { %3944 = vsyncpa [#allocation4], 1 }
0x167b   :  { %3946 = vsyncpa [#allocation4 + $0x1], 1 }

</bundles_post_ra>
